<compile_context>
chip_gen: v6e
topology: v6e:2x2x1
jax: 0.10.0
libtpu: 0.0.40
codegen_flags: <defaults>
</compile_context>

<pallas_src>
import functools

import jax
import jax.numpy as jnp
import numpy as np
from jax import lax
from jax.experimental import pallas as pl
from jax.experimental.pallas import tpu as pltpu


def _sigmoid(x):
    # numerically stable logistic; tanh lowers to the EUP slot.
    return 0.5 * (jnp.tanh(0.5 * x) + 1.0)


def _softmax_over_seq(x):
    # softmax over axis=1 (the sequence axis of a (Bt, S, Lt) tile);
    # sublane-axis reduction + EUP approximate reciprocal.
    m = jnp.max(x, axis=1, keepdims=True)
    e = jnp.exp(x - m)
    return e * pl.reciprocal(jnp.sum(e, axis=1, keepdims=True), approx=True)


def hybrid_xml_kernel(x_ref,      # (Bt, S, E)        f32  BERT sequence output tile
                      lqT_ref,    # (H, Lt)           bf16 (label_emb @ wq + bq)^T chunk
                      wk_ref,     # (E, H)            bf16 key_layer
                      bk_ref,     # (1, H)            f32
                      w1_ref,     # (E, DA)           bf16 linear_first
                      b1_ref,     # (1, DA)           f32
                      w2_ref,     # (DA, Lt)          bf16 linear_second chunk
                      b2_ref,     # (1, Lt)           f32
                      ww1_ref,    # (1, E)            f32  linear_weight1 (row)
                      bw1_ref,    # (1, 1)            f32
                      ww2_ref,    # (1, E)            f32  linear_weight2 (row)
                      bw2_ref,    # (1, 1)            f32
                      wfold_ref,  # (E, H)            bf16 wd @ wf (folded head)
                      bfold_ref,  # (1, H)            f32  bd @ wf + bf
                      wo_ref,     # (1, H)            f32  output_layer (row)
                      bo_ref,     # (1, 1)            f32
                      out_ref,    # (1, 1, 1, Bt*Lt)  f32  lane-dense scores
                      key_s,      # (Bt*S, H)   bf16 scratch: key_layer(x)
                      ta_s,       # (Bt*S, DA)  bf16 scratch: tanh(linear_first(x))
                      xw1_s,      # (Bt, S)     f32  scratch: x @ ww1
                      xw2_s):     # (Bt, S)     f32  scratch: x @ ww2
    f32, bf16 = jnp.float32, jnp.bfloat16
    Bt, S, E = x_ref.shape
    Lt = lqT_ref.shape[1]

    x = x_ref[...]                                   # (Bt, S, E) f32
    xb = x.astype(bf16)                              # MXU operand

    # ---- label-invariant projections: once per batch tile, at label chunk 0,
    # ---- kept in VMEM scratch across the label-chunk ("arbitrary") axis. ----
    @pl.when(pl.program_id(1) == 0)
    def _():
        x2b = xb.reshape(Bt * S, E)
        key = jnp.dot(x2b, wk_ref[...], preferred_element_type=f32) + bk_ref[...]
        key_s[...] = key.astype(bf16)
        ta = jnp.tanh(jnp.dot(x2b, w1_ref[...], preferred_element_type=f32)
                      + b1_ref[...])
        ta_s[...] = ta.astype(bf16)
        # gate pre-projections, re-associated: (attn @ x) @ w == attn @ (x @ w)
        xw1_s[...] = jnp.sum(x * ww1_ref[...], axis=-1)      # (Bt, S)
        xw2_s[...] = jnp.sum(x * ww2_ref[...], axis=-1)      # (Bt, S)

    # ---- label-query attention branch (one full-N matmul per step) ---------
    sim = jnp.dot(key_s[...], lqT_ref[...], preferred_element_type=f32)  # (Bt*S, Lt)
    sim = _softmax_over_seq(sim.reshape(Bt, S, Lt))                      # (Bt, S, Lt)
    g1 = jnp.sum(sim * xw1_s[...][:, :, None], axis=1) + bw1_ref[...]    # (Bt, Lt)
    sim_t = jnp.swapaxes(sim.astype(bf16), 1, 2)                         # (Bt, Lt, S)
    out1 = jnp.einsum('bls,bse->ble', sim_t, xb,
                      preferred_element_type=f32)                        # (Bt, Lt, E)

    # ---- self-attention branch ----------------------------------------------
    sa = jnp.dot(ta_s[...], w2_ref[...], preferred_element_type=f32) + b2_ref[...]
    sab = _softmax_over_seq(sa.reshape(Bt, S, Lt))                       # (Bt, S, Lt)
    g2 = jnp.sum(sab * xw2_s[...][:, :, None], axis=1) + bw2_ref[...]    # (Bt, Lt)
    sab_t = jnp.swapaxes(sab.astype(bf16), 1, 2)                         # (Bt, Lt, S)
    out2 = jnp.einsum('bls,bse->ble', sab_t, xb,
                      preferred_element_type=f32)                        # (Bt, Lt, E)

    # ---- gated fusion --------------------------------------------------------
    f1 = _sigmoid(g1)
    f2 = _sigmoid(g2)
    f1 = f1 / (f1 + f2)
    out = f1[:, :, None] * out1 + (1.0 - f1)[:, :, None] * out2          # (Bt, Lt, E)

    # ---- folded projection head: (E -> 768 -> H) as one (E, H) matmul -------
    z = jnp.dot(out.reshape(Bt * Lt, E).astype(bf16), wfold_ref[...],
                preferred_element_type=f32)
    z = jnp.maximum(z + bfold_ref[...], 0.0)                             # (Bt*Lt, H)

    # ---- lane-dense logits row: wo_row @ z^T -> (1, Bt*Lt) -------------------
    logits = lax.dot_general(wo_ref[...], z, (((1,), (1,)), ((), ())),
                             preferred_element_type=f32) + bo_ref[...]
    out_ref[0, 0] = _sigmoid(logits)


def prepare_weights(params):
    """Batch-invariant algebraic precompute; call once, outside the jitted forward."""
    f32, bf16 = jnp.float32, jnp.bfloat16
    lqT = (params["label_emb"] @ params["wq"] + params["bq"]).T.astype(bf16)  # (H, L)
    wfold = (params["wd"] @ params["wf"]).astype(bf16)                        # (E, H)
    bfold = (params["bd"] @ params["wf"] + params["bf"]).astype(f32)          # (1, H)
    return {
        "lqT": lqT,
        "wk": params["wk"].astype(bf16), "bk": params["bk"].astype(f32),
        "w1": params["w1"].astype(bf16), "b1": params["b1"].astype(f32),
        "w2": params["w2"].astype(bf16), "b2": params["b2"].astype(f32),
        "ww1": params["ww1"].T.astype(f32), "bw1": params["bw1"].astype(f32),
        "ww2": params["ww2"].T.astype(f32), "bw2": params["bw2"].astype(f32),
        "wfold": wfold, "bfold": bfold,
        "wo": params["wo"].T.astype(f32), "bo": params["bo"].astype(f32),
    }


def _pick_batch_tile(B, S):
    # grid length >= 2 when possible (megacore sharding + DMA pipelining),
    # while aiming for Bt*S ~ 256 rows for the flattened MXU matmuls.
    target = max(1, min(B // 2 if B > 1 else B, max(1, 256 // max(S, 1))))
    for bt in range(target, 0, -1):
        if B % bt == 0:
            return bt
    return 1


def _pick_label_tile(L):
    # label chunks bound the (Bt*Lt, E) f32 intermediates; a chunk must be a
    # multiple of 128 lanes (or the full label count).
    if L <= 512:
        return L
    for lt in (512, 384, 256, 128):
        if L % lt == 0:
            return lt
    return L


def hybrid_xml_forward(x, prepared, *, batch_tile=None, label_tile=None):
    """x: (B, S, E) BERT sequence output (f32). Returns (B, num_labels) scores."""
    B, S, E = x.shape
    H, L = prepared["lqT"].shape
    DA = prepared["w1"].shape[1]
    f32 = jnp.float32

    Bt = batch_tile if batch_tile is not None else _pick_batch_tile(B, S)
    Lt = label_tile if label_tile is not None else _pick_label_tile(L)
    assert B % Bt == 0, (B, Bt)
    assert L % Lt == 0 and (Lt == L or Lt % 128 == 0), (L, Lt)
    gi, gj = B // Bt, L // Lt

    weights = [prepared["lqT"],
               prepared["wk"], prepared["bk"],
               prepared["w1"], prepared["b1"],
               prepared["w2"], prepared["b2"],
               prepared["ww1"], prepared["bw1"],
               prepared["ww2"], prepared["bw2"],
               prepared["wfold"], prepared["bfold"],
               prepared["wo"], prepared["bo"]]

    def const_spec(a):
        # Invariant weights: constant index_map, so they are fetched once.
        nd = a.ndim
        return pl.BlockSpec(a.shape, lambda i, j, _nd=nd: (0,) * _nd)

    in_specs = [pl.BlockSpec((Bt, S, E), lambda i, j: (i, 0, 0)),   # x tile
                pl.BlockSpec((H, Lt), lambda i, j: (0, j)),         # lqT chunk
                const_spec(prepared["wk"]), const_spec(prepared["bk"]),
                const_spec(prepared["w1"]), const_spec(prepared["b1"]),
                pl.BlockSpec((DA, Lt), lambda i, j: (0, j)),        # w2 chunk
                pl.BlockSpec((1, Lt), lambda i, j: (0, j)),         # b2 chunk
                const_spec(prepared["ww1"]), const_spec(prepared["bw1"]),
                const_spec(prepared["ww2"]), const_spec(prepared["bw2"]),
                const_spec(prepared["wfold"]), const_spec(prepared["bfold"]),
                const_spec(prepared["wo"]), const_spec(prepared["bo"])]

    out = pl.pallas_call(
        hybrid_xml_kernel,
        out_shape=jax.ShapeDtypeStruct((gi, gj, 1, Bt * Lt), f32),
        grid=(gi, gj),
        in_specs=in_specs,
        out_specs=pl.BlockSpec((1, 1, 1, Bt * Lt), lambda i, j: (i, j, 0, 0)),
        scratch_shapes=[pltpu.VMEM((Bt * S, H), jnp.bfloat16),   # key_layer(x)
                        pltpu.VMEM((Bt * S, DA), jnp.bfloat16),  # tanh(linear_first(x))
                        pltpu.VMEM((Bt, S), f32),                # x @ ww1
                        pltpu.VMEM((Bt, S), f32)],               # x @ ww2
        compiler_params=pltpu.CompilerParams(
            dimension_semantics=("parallel", "arbitrary"),
            vmem_limit_bytes=48 * 1024 * 1024),
    )(x, *weights)

    # (gi, gj, 1, Bt*Lt) -> (B, L)
    return out.reshape(gi, gj, Bt, Lt).transpose(0, 2, 1, 3).reshape(B, L)


def init_params(key, *, num_labels, embedding_size, hidden_size, d_a, mid_size):
    """Deterministic synthetic parameters (shapes follow Hybrid_XML.__init__)."""
    ks = jax.random.split(key, 10)

    def lin(k, fan_in, fan_out, scale=0.05):
        kw, kb = jax.random.split(k)
        w = jax.random.normal(kw, (fan_in, fan_out), jnp.float32) * scale
        b = jax.random.normal(kb, (1, fan_out), jnp.float32) * scale
        return w, b

    p = {}
    std = float(np.sqrt(2.0 / (num_labels + 7)))   # xavier_normal_-style std
    p["label_emb"] = jax.random.normal(ks[0], (num_labels, 7), jnp.float32) * std
    p["wk"], p["bk"] = lin(ks[1], embedding_size, hidden_size)      # key_layer
    p["wq"], p["bq"] = lin(ks[2], 7, hidden_size)                   # query_layer
    p["w1"], p["b1"] = lin(ks[3], embedding_size, d_a)              # linear_first
    p["w2"], p["b2"] = lin(ks[4], d_a, num_labels)                  # linear_second
    p["ww1"], p["bw1"] = lin(ks[5], embedding_size, 1)              # linear_weight1
    p["ww2"], p["bw2"] = lin(ks[6], embedding_size, 1)              # linear_weight2
    p["wd"], p["bd"] = lin(ks[7], embedding_size, mid_size)         # decrease_emb_size
    p["wf"], p["bf"] = lin(ks[8], mid_size, hidden_size)            # linear_final
    p["wo"], p["bo"] = lin(ks[9], hidden_size, 1)                   # output_layer
    return p


def ref_forward(x, p):
    """Plain-JAX f32 reference mirroring the PyTorch forward (unfolded weights)."""
    attn_key = x @ p["wk"] + p["bk"]                                # (B,S,H)
    label_q = p["label_emb"] @ p["wq"] + p["bq"]                    # (L,H)
    sim = jnp.einsum("lh,bsh->bls", label_q, attn_key)              # (B,L,S)
    sim = jax.nn.softmax(sim, axis=2)
    out1 = jnp.einsum("bls,bse->ble", sim, x)                       # (B,L,E)

    sa = jnp.tanh(x @ p["w1"] + p["b1"])                            # (B,S,d_a)
    sa = sa @ p["w2"] + p["b2"]                                     # (B,S,L)
    sa = jax.nn.softmax(sa, axis=1)
    out2 = jnp.einsum("bsl,bse->ble", sa, x)                        # (B,L,E)

    f1 = jax.nn.sigmoid(out1 @ p["ww1"] + p["bw1"])
    f2 = jax.nn.sigmoid(out2 @ p["ww2"] + p["bw2"])
    f1 = f1 / (f1 + f2)
    f2 = 1.0 - f1
    out = f1 * out1 + f2 * out2
    out = out @ p["wd"] + p["bd"]
    out = jax.nn.relu(out @ p["wf"] + p["bf"])
    return jax.nn.sigmoid((out @ p["wo"] + p["bo"])[..., 0])


if __name__ == "__main__":
    # Small shapes consistent with the module's forward:
    #   B=2 batch, S=8 sequence, E=64 "embedding_size" (BERT feature dim here),
    #   H=32 hidden_size, d_a=32, L=256 num_labels (tiled at Lt=128), MID=768.
    B, S, E = 2, 8, 64
    H, DA, L, MID = 32, 32, 256, 768

    key = jax.random.PRNGKey(0)
    kx, kp = jax.random.split(key)
    x = jax.random.normal(kx, (B, S, E), jnp.float32)   # stand-in for bert(...)[0]
    params = init_params(kp, num_labels=L, embedding_size=E,
                         hidden_size=H, d_a=DA, mid_size=MID)

    prepared = prepare_weights(params)   # once, outside the jitted forward
    fwd = jax.jit(functools.partial(hybrid_xml_forward,
                                    batch_tile=1, label_tile=128))
    out = jax.block_until_ready(fwd(x, prepared))

    ref = ref_forward(x, params)
    assert out.shape == (B, L), out.shape
    np.testing.assert_allclose(np.asarray(out), np.asarray(ref),
                               rtol=2e-2, atol=2e-2)
    print("KERNEL_OK")
</pallas_src>

<mosaic_0001>
module attributes {stable_mosaic.version = 11 : i64} {
  func.func @hybrid_xml_kernel(%arg0: i32, %arg1: i32, %arg2: memref<1x8x64xf32, #tpu.memory_space<vmem>>, %arg3: memref<32x128xbf16, #tpu.memory_space<vmem>>, %arg4: memref<64x32xbf16, #tpu.memory_space<vmem>>, %arg5: memref<1x32xf32, #tpu.memory_space<vmem>>, %arg6: memref<64x32xbf16, #tpu.memory_space<vmem>>, %arg7: memref<1x32xf32, #tpu.memory_space<vmem>>, %arg8: memref<32x128xbf16, #tpu.memory_space<vmem>>, %arg9: memref<1x128xf32, #tpu.memory_space<vmem>>, %arg10: memref<1x64xf32, #tpu.memory_space<vmem>>, %arg11: memref<1x1xf32, #tpu.memory_space<vmem>>, %arg12: memref<1x64xf32, #tpu.memory_space<vmem>>, %arg13: memref<1x1xf32, #tpu.memory_space<vmem>>, %arg14: memref<64x32xbf16, #tpu.memory_space<vmem>>, %arg15: memref<1x32xf32, #tpu.memory_space<vmem>>, %arg16: memref<1x32xf32, #tpu.memory_space<vmem>>, %arg17: memref<1x1xf32, #tpu.memory_space<vmem>>, %arg18: memref<1x1x1x128xf32, #tpu.memory_space<vmem>>, %arg19: memref<8x32xbf16, #tpu.memory_space<vmem>>, %arg20: memref<8x32xbf16, #tpu.memory_space<vmem>>, %arg21: memref<1x8xf32, #tpu.memory_space<vmem>>, %arg22: memref<1x8xf32, #tpu.memory_space<vmem>>) attributes {dimension_semantics = [#tpu.dimension_semantics<parallel>, #tpu.dimension_semantics<arbitrary>], iteration_bounds = array<i64: 2, 2>, scalar_prefetch = 0 : i64, scratch_operands = 4 : i64, tpu.core_type = #tpu.core_type<tc>, window_params = [{transform_indices = @transform_0, window_bounds = array<i64: 1, 8, 64>}, {transform_indices = @transform_1, window_bounds = array<i64: 32, 128>}, {pipeline_mode = #tpu.pipeline_mode<synchronous>, transform_indices = @transform_2, window_bounds = array<i64: 64, 32>}, {pipeline_mode = #tpu.pipeline_mode<synchronous>, transform_indices = @transform_3, window_bounds = array<i64: 1, 32>}, {pipeline_mode = #tpu.pipeline_mode<synchronous>, transform_indices = @transform_4, window_bounds = array<i64: 64, 32>}, {pipeline_mode = #tpu.pipeline_mode<synchronous>, transform_indices = @transform_5, window_bounds = array<i64: 1, 32>}, {transform_indices = @transform_6, window_bounds = array<i64: 32, 128>}, {transform_indices = @transform_7, window_bounds = array<i64: 1, 128>}, {pipeline_mode = #tpu.pipeline_mode<synchronous>, transform_indices = @transform_8, window_bounds = array<i64: 1, 64>}, {pipeline_mode = #tpu.pipeline_mode<synchronous>, transform_indices = @transform_9, window_bounds = array<i64: 1, 1>}, {pipeline_mode = #tpu.pipeline_mode<synchronous>, transform_indices = @transform_10, window_bounds = array<i64: 1, 64>}, {pipeline_mode = #tpu.pipeline_mode<synchronous>, transform_indices = @transform_11, window_bounds = array<i64: 1, 1>}, {pipeline_mode = #tpu.pipeline_mode<synchronous>, transform_indices = @transform_12, window_bounds = array<i64: 64, 32>}, {pipeline_mode = #tpu.pipeline_mode<synchronous>, transform_indices = @transform_13, window_bounds = array<i64: 1, 32>}, {pipeline_mode = #tpu.pipeline_mode<synchronous>, transform_indices = @transform_14, window_bounds = array<i64: 1, 32>}, {pipeline_mode = #tpu.pipeline_mode<synchronous>, transform_indices = @transform_15, window_bounds = array<i64: 1, 1>}, {transform_indices = @transform_16, window_bounds = array<i64: 1, 1, 1, 128>}]} {
    %c0 = arith.constant 0 : index
    %c0_0 = arith.constant 0 : index
    %c0_1 = arith.constant 0 : index
    %0 = vector.load %arg2[%c0, %c0_0, %c0_1] : memref<1x8x64xf32, #tpu.memory_space<vmem>>, vector<1x8x64xf32>
    %1 = arith.truncf %0 : vector<1x8x64xf32> to vector<1x8x64xbf16>
    %c0_i32 = arith.constant 0 : i32
    %2 = arith.cmpi eq, %arg1, %c0_i32 : i32
    %3 = arith.extui %2 : i1 to i32
    %c0_i32_2 = arith.constant 0 : i32
    %4 = arith.cmpi ne, %3, %c0_i32_2 : i32
    scf.if %4 {
      %107 = vector.shape_cast %1 : vector<1x8x64xbf16> to vector<8x64xbf16>
      %c0_55 = arith.constant 0 : index
      %c0_56 = arith.constant 0 : index
      %108 = vector.load %arg4[%c0_55, %c0_56] : memref<64x32xbf16, #tpu.memory_space<vmem>>, vector<64x32xbf16>
      %cst_57 = arith.constant dense<0.000000e+00> : vector<8x32xf32>
      %109 = tpu.matmul %107, %108, %cst_57 {dimension_numbers = #tpu.dot_dimension_numbers<[1], [0], [0], [1], [0, 0, 1, 1], [], []>} : vector<8x64xbf16>, vector<64x32xbf16>, vector<8x32xf32> -> vector<8x32xf32>
      %c0_58 = arith.constant 0 : index
      %c0_59 = arith.constant 0 : index
      %110 = vector.load %arg5[%c0_58, %c0_59] : memref<1x32xf32, #tpu.memory_space<vmem>>, vector<1x32xf32>
      %111 = vector.broadcast %110 : vector<1x32xf32> to vector<8x32xf32>
      %112 = arith.addf %109, %111 : vector<8x32xf32>
      %113 = arith.truncf %112 : vector<8x32xf32> to vector<8x32xbf16>
      %c0_60 = arith.constant 0 : index
      %c0_61 = arith.constant 0 : index
      %114 = vector.load %arg19[%c0_60, %c0_61] : memref<8x32xbf16, #tpu.memory_space<vmem>>, vector<8x32xbf16>
      tpu.vector_store %arg19[%c0_60, %c0_61], %113 {strides = array<i32>} : memref<8x32xbf16, #tpu.memory_space<vmem>>, vector<8x32xbf16>,
      %c0_62 = arith.constant 0 : index
      %c0_63 = arith.constant 0 : index
      %115 = vector.load %arg6[%c0_62, %c0_63] : memref<64x32xbf16, #tpu.memory_space<vmem>>, vector<64x32xbf16>
      %cst_64 = arith.constant dense<0.000000e+00> : vector<8x32xf32>
      %116 = tpu.matmul %107, %115, %cst_64 {dimension_numbers = #tpu.dot_dimension_numbers<[1], [0], [0], [1], [0, 0, 1, 1], [], []>} : vector<8x64xbf16>, vector<64x32xbf16>, vector<8x32xf32> -> vector<8x32xf32>
      %c0_65 = arith.constant 0 : index
      %c0_66 = arith.constant 0 : index
      %117 = vector.load %arg7[%c0_65, %c0_66] : memref<1x32xf32, #tpu.memory_space<vmem>>, vector<1x32xf32>
      %118 = vector.broadcast %117 : vector<1x32xf32> to vector<8x32xf32>
      %119 = arith.addf %116, %118 : vector<8x32xf32>
      %120 = math.tanh %119 : vector<8x32xf32>
      %121 = arith.truncf %120 : vector<8x32xf32> to vector<8x32xbf16>
      %c0_67 = arith.constant 0 : index
      %c0_68 = arith.constant 0 : index
      %122 = vector.load %arg20[%c0_67, %c0_68] : memref<8x32xbf16, #tpu.memory_space<vmem>>, vector<8x32xbf16>
      tpu.vector_store %arg20[%c0_67, %c0_68], %121 {strides = array<i32>} : memref<8x32xbf16, #tpu.memory_space<vmem>>, vector<8x32xbf16>,
      %c0_69 = arith.constant 0 : index
      %c0_70 = arith.constant 0 : index
      %123 = vector.load %arg10[%c0_69, %c0_70] : memref<1x64xf32, #tpu.memory_space<vmem>>, vector<1x64xf32>
      %124 = vector.shape_cast %123 : vector<1x64xf32> to vector<1x1x64xf32>
      %125 = vector.broadcast %124 : vector<1x1x64xf32> to vector<1x8x64xf32>
      %126 = arith.mulf %0, %125 : vector<1x8x64xf32>
      %cst_71 = arith.constant dense<0.000000e+00> : vector<1x8xf32>
      %127 = vector.multi_reduction <add>, %126, %cst_71 [2] : vector<1x8x64xf32> to vector<1x8xf32>
      %c0_72 = arith.constant 0 : index
      %c0_73 = arith.constant 0 : index
      %128 = vector.load %arg21[%c0_72, %c0_73] : memref<1x8xf32, #tpu.memory_space<vmem>>, vector<1x8xf32>
      tpu.vector_store %arg21[%c0_72, %c0_73], %127 {strides = array<i32>} : memref<1x8xf32, #tpu.memory_space<vmem>>, vector<1x8xf32>,
      %c0_74 = arith.constant 0 : index
      %c0_75 = arith.constant 0 : index
      %129 = vector.load %arg12[%c0_74, %c0_75] : memref<1x64xf32, #tpu.memory_space<vmem>>, vector<1x64xf32>
      %130 = vector.shape_cast %129 : vector<1x64xf32> to vector<1x1x64xf32>
      %131 = vector.broadcast %130 : vector<1x1x64xf32> to vector<1x8x64xf32>
      %132 = arith.mulf %0, %131 : vector<1x8x64xf32>
      %cst_76 = arith.constant dense<0.000000e+00> : vector<1x8xf32>
      %133 = vector.multi_reduction <add>, %132, %cst_76 [2] : vector<1x8x64xf32> to vector<1x8xf32>
      %c0_77 = arith.constant 0 : index
      %c0_78 = arith.constant 0 : index
      %134 = vector.load %arg22[%c0_77, %c0_78] : memref<1x8xf32, #tpu.memory_space<vmem>>, vector<1x8xf32>
      tpu.vector_store %arg22[%c0_77, %c0_78], %133 {strides = array<i32>} : memref<1x8xf32, #tpu.memory_space<vmem>>, vector<1x8xf32>,
    } else {
    }
    %c0_3 = arith.constant 0 : index
    %c0_4 = arith.constant 0 : index
    %5 = vector.load %arg19[%c0_3, %c0_4] : memref<8x32xbf16, #tpu.memory_space<vmem>>, vector<8x32xbf16>
    %c0_5 = arith.constant 0 : index
    %c0_6 = arith.constant 0 : index
    %6 = vector.load %arg3[%c0_5, %c0_6] : memref<32x128xbf16, #tpu.memory_space<vmem>>, vector<32x128xbf16>
    %cst = arith.constant dense<0.000000e+00> : vector<8x128xf32>
    %7 = tpu.matmul %5, %6, %cst {dimension_numbers = #tpu.dot_dimension_numbers<[1], [0], [0], [1], [0, 0, 1, 1], [], []>} : vector<8x32xbf16>, vector<32x128xbf16>, vector<8x128xf32> -> vector<8x128xf32>
    %8 = vector.shape_cast %7 : vector<8x128xf32> to vector<1x8x128xf32>
    %cst_7 = arith.constant dense<0xFF800000> : vector<1x128xf32>
    %9 = vector.multi_reduction <maximumf>, %8, %cst_7 [1] : vector<1x8x128xf32> to vector<1x128xf32>
    %10 = vector.shape_cast %9 : vector<1x128xf32> to vector<1x1x128xf32>
    %11 = vector.broadcast %10 : vector<1x1x128xf32> to vector<1x8x128xf32>
    %12 = arith.subf %8, %11 : vector<1x8x128xf32>
    %13 = math.exp %12 : vector<1x8x128xf32>
    %cst_8 = arith.constant dense<0.000000e+00> : vector<1x128xf32>
    %14 = vector.multi_reduction <add>, %13, %cst_8 [1] : vector<1x8x128xf32> to vector<1x128xf32>
    %15 = vector.shape_cast %14 : vector<1x128xf32> to vector<1x1x128xf32>
    %16 = tpu.reciprocal %15 {approx = true} : vector<1x1x128xf32> -> vector<1x1x128xf32>
    %17 = vector.broadcast %16 : vector<1x1x128xf32> to vector<1x8x128xf32>
    %18 = arith.mulf %13, %17 : vector<1x8x128xf32>
    %c0_9 = arith.constant 0 : index
    %c0_10 = arith.constant 0 : index
    %19 = vector.load %arg21[%c0_9, %c0_10] : memref<1x8xf32, #tpu.memory_space<vmem>>, vector<1x8xf32>
    %20 = vector.shape_cast %19 : vector<1x8xf32> to vector<1x8x1xf32>
    %21 = vector.broadcast %20 : vector<1x8x1xf32> to vector<1x8x128xf32>
    %22 = arith.mulf %18, %21 : vector<1x8x128xf32>
    %cst_11 = arith.constant dense<0.000000e+00> : vector<1x128xf32>
    %23 = vector.multi_reduction <add>, %22, %cst_11 [1] : vector<1x8x128xf32> to vector<1x128xf32>
    %c0_12 = arith.constant 0 : index
    %c0_13 = arith.constant 0 : index
    %24 = vector.load %arg11[%c0_12, %c0_13] : memref<1x1xf32, #tpu.memory_space<vmem>>, vector<1x1xf32>
    %25 = vector.broadcast %24 : vector<1x1xf32> to vector<1x128xf32>
    %26 = arith.addf %23, %25 : vector<1x128xf32>
    %27 = arith.truncf %18 : vector<1x8x128xf32> to vector<1x8x128xbf16>
    %28 = tpu.transpose %27, [0, 2, 1] : vector<1x8x128xbf16> -> vector<1x128x8xbf16>
    "tpu.trace_start"() <{level = 10 : i32, message = "bls,bse->ble"}> : () -> ()
    %cst_14 = arith.constant dense<0.000000e+00> : vector<1x128x64xf32>
    %29 = tpu.matmul %28, %1, %cst_14 {dimension_numbers = #tpu.dot_dimension_numbers<[2], [1], [1], [2], [0, 0, 0, 1, 1, 2], [0], [0]>} : vector<1x128x8xbf16>, vector<1x8x64xbf16>, vector<1x128x64xf32> -> vector<1x128x64xf32>
    "tpu.trace_stop"() : () -> ()
    %c0_15 = arith.constant 0 : index
    %c0_16 = arith.constant 0 : index
    %30 = vector.load %arg20[%c0_15, %c0_16] : memref<8x32xbf16, #tpu.memory_space<vmem>>, vector<8x32xbf16>
    %c0_17 = arith.constant 0 : index
    %c0_18 = arith.constant 0 : index
    %31 = vector.load %arg8[%c0_17, %c0_18] : memref<32x128xbf16, #tpu.memory_space<vmem>>, vector<32x128xbf16>
    %cst_19 = arith.constant dense<0.000000e+00> : vector<8x128xf32>
    %32 = tpu.matmul %30, %31, %cst_19 {dimension_numbers = #tpu.dot_dimension_numbers<[1], [0], [0], [1], [0, 0, 1, 1], [], []>} : vector<8x32xbf16>, vector<32x128xbf16>, vector<8x128xf32> -> vector<8x128xf32>
    %c0_20 = arith.constant 0 : index
    %c0_21 = arith.constant 0 : index
    %33 = vector.load %arg9[%c0_20, %c0_21] : memref<1x128xf32, #tpu.memory_space<vmem>>, vector<1x128xf32>
    %34 = vector.broadcast %33 : vector<1x128xf32> to vector<8x128xf32>
    %35 = arith.addf %32, %34 : vector<8x128xf32>
    %36 = vector.shape_cast %35 : vector<8x128xf32> to vector<1x8x128xf32>
    %cst_22 = arith.constant dense<0xFF800000> : vector<1x128xf32>
    %37 = vector.multi_reduction <maximumf>, %36, %cst_22 [1] : vector<1x8x128xf32> to vector<1x128xf32>
    %38 = vector.shape_cast %37 : vector<1x128xf32> to vector<1x1x128xf32>
    %39 = vector.broadcast %38 : vector<1x1x128xf32> to vector<1x8x128xf32>
    %40 = arith.subf %36, %39 : vector<1x8x128xf32>
    %41 = math.exp %40 : vector<1x8x128xf32>
    %cst_23 = arith.constant dense<0.000000e+00> : vector<1x128xf32>
    %42 = vector.multi_reduction <add>, %41, %cst_23 [1] : vector<1x8x128xf32> to vector<1x128xf32>
    %43 = vector.shape_cast %42 : vector<1x128xf32> to vector<1x1x128xf32>
    %44 = tpu.reciprocal %43 {approx = true} : vector<1x1x128xf32> -> vector<1x1x128xf32>
    %45 = vector.broadcast %44 : vector<1x1x128xf32> to vector<1x8x128xf32>
    %46 = arith.mulf %41, %45 : vector<1x8x128xf32>
    %c0_24 = arith.constant 0 : index
    %c0_25 = arith.constant 0 : index
    %47 = vector.load %arg22[%c0_24, %c0_25] : memref<1x8xf32, #tpu.memory_space<vmem>>, vector<1x8xf32>
    %48 = vector.shape_cast %47 : vector<1x8xf32> to vector<1x8x1xf32>
    %49 = vector.broadcast %48 : vector<1x8x1xf32> to vector<1x8x128xf32>
    %50 = arith.mulf %46, %49 : vector<1x8x128xf32>
    %cst_26 = arith.constant dense<0.000000e+00> : vector<1x128xf32>
    %51 = vector.multi_reduction <add>, %50, %cst_26 [1] : vector<1x8x128xf32> to vector<1x128xf32>
    %c0_27 = arith.constant 0 : index
    %c0_28 = arith.constant 0 : index
    %52 = vector.load %arg13[%c0_27, %c0_28] : memref<1x1xf32, #tpu.memory_space<vmem>>, vector<1x1xf32>
    %53 = vector.broadcast %52 : vector<1x1xf32> to vector<1x128xf32>
    %54 = arith.addf %51, %53 : vector<1x128xf32>
    %55 = arith.truncf %46 : vector<1x8x128xf32> to vector<1x8x128xbf16>
    %56 = tpu.transpose %55, [0, 2, 1] : vector<1x8x128xbf16> -> vector<1x128x8xbf16>
    "tpu.trace_start"() <{level = 10 : i32, message = "bls,bse->ble"}> : () -> ()
    %cst_29 = arith.constant dense<0.000000e+00> : vector<1x128x64xf32>
    %57 = tpu.matmul %56, %1, %cst_29 {dimension_numbers = #tpu.dot_dimension_numbers<[2], [1], [1], [2], [0, 0, 0, 1, 1, 2], [0], [0]>} : vector<1x128x8xbf16>, vector<1x8x64xbf16>, vector<1x128x64xf32> -> vector<1x128x64xf32>
    "tpu.trace_stop"() : () -> ()
    %cst_30 = arith.constant 5.000000e-01 : f32
    %58 = vector.broadcast %cst_30 : f32 to vector<1x128xf32>
    %59 = arith.mulf %58, %26 : vector<1x128xf32>
    %60 = math.tanh %59 : vector<1x128xf32>
    %cst_31 = arith.constant 1.000000e+00 : f32
    %61 = vector.broadcast %cst_31 : f32 to vector<1x128xf32>
    %62 = arith.addf %60, %61 : vector<1x128xf32>
    %cst_32 = arith.constant 5.000000e-01 : f32
    %63 = vector.broadcast %cst_32 : f32 to vector<1x128xf32>
    %64 = arith.mulf %63, %62 : vector<1x128xf32>
    %cst_33 = arith.constant 5.000000e-01 : f32
    %65 = vector.broadcast %cst_33 : f32 to vector<1x128xf32>
    %66 = arith.mulf %65, %54 : vector<1x128xf32>
    %67 = math.tanh %66 : vector<1x128xf32>
    %cst_34 = arith.constant 1.000000e+00 : f32
    %68 = vector.broadcast %cst_34 : f32 to vector<1x128xf32>
    %69 = arith.addf %67, %68 : vector<1x128xf32>
    %cst_35 = arith.constant 5.000000e-01 : f32
    %70 = vector.broadcast %cst_35 : f32 to vector<1x128xf32>
    %71 = arith.mulf %70, %69 : vector<1x128xf32>
    %72 = arith.addf %64, %71 : vector<1x128xf32>
    %73 = arith.divf %64, %72 : vector<1x128xf32>
    %74 = vector.shape_cast %73 : vector<1x128xf32> to vector<1x128x1xf32>
    %75 = vector.broadcast %74 : vector<1x128x1xf32> to vector<1x128x64xf32>
    %76 = arith.mulf %75, %29 : vector<1x128x64xf32>
    %cst_36 = arith.constant 1.000000e+00 : f32
    %77 = vector.broadcast %cst_36 : f32 to vector<1x128xf32>
    %78 = arith.subf %77, %73 : vector<1x128xf32>
    %79 = vector.shape_cast %78 : vector<1x128xf32> to vector<1x128x1xf32>
    %80 = vector.broadcast %79 : vector<1x128x1xf32> to vector<1x128x64xf32>
    %81 = arith.mulf %80, %57 : vector<1x128x64xf32>
    %82 = arith.addf %76, %81 : vector<1x128x64xf32>
    %83 = vector.shape_cast %82 : vector<1x128x64xf32> to vector<128x64xf32>
    %84 = arith.truncf %83 : vector<128x64xf32> to vector<128x64xbf16>
    %c0_37 = arith.constant 0 : index
    %c0_38 = arith.constant 0 : index
    %85 = vector.load %arg14[%c0_37, %c0_38] : memref<64x32xbf16, #tpu.memory_space<vmem>>, vector<64x32xbf16>
    %cst_39 = arith.constant dense<0.000000e+00> : vector<128x32xf32>
    %86 = tpu.matmul %84, %85, %cst_39 {dimension_numbers = #tpu.dot_dimension_numbers<[1], [0], [0], [1], [0, 0, 1, 1], [], []>} : vector<128x64xbf16>, vector<64x32xbf16>, vector<128x32xf32> -> vector<128x32xf32>
    %c0_40 = arith.constant 0 : index
    %c0_41 = arith.constant 0 : index
    %87 = vector.load %arg15[%c0_40, %c0_41] : memref<1x32xf32, #tpu.memory_space<vmem>>, vector<1x32xf32>
    %88 = vector.broadcast %87 : vector<1x32xf32> to vector<128x32xf32>
    %89 = arith.addf %86, %88 : vector<128x32xf32>
    %cst_42 = arith.constant 0.000000e+00 : f32
    %90 = vector.broadcast %cst_42 : f32 to vector<128x32xf32>
    %91 = arith.maximumf %89, %90 : vector<128x32xf32>
    %c0_43 = arith.constant 0 : index
    %c0_44 = arith.constant 0 : index
    %92 = vector.load %arg16[%c0_43, %c0_44] : memref<1x32xf32, #tpu.memory_space<vmem>>, vector<1x32xf32>
    %cst_45 = arith.constant dense<0.000000e+00> : vector<1x128xf32>
    %93 = tpu.matmul %92, %91, %cst_45 {dimension_numbers = #tpu.dot_dimension_numbers<[1], [1], [0], [0], [0, 0, 1, 0], [], []>} : vector<1x32xf32>, vector<128x32xf32>, vector<1x128xf32> -> vector<1x128xf32>
    %c0_46 = arith.constant 0 : index
    %c0_47 = arith.constant 0 : index
    %94 = vector.load %arg17[%c0_46, %c0_47] : memref<1x1xf32, #tpu.memory_space<vmem>>, vector<1x1xf32>
    %95 = vector.broadcast %94 : vector<1x1xf32> to vector<1x128xf32>
    %96 = arith.addf %93, %95 : vector<1x128xf32>
    %cst_48 = arith.constant 5.000000e-01 : f32
    %97 = vector.broadcast %cst_48 : f32 to vector<1x128xf32>
    %98 = arith.mulf %97, %96 : vector<1x128xf32>
    %99 = math.tanh %98 : vector<1x128xf32>
    %cst_49 = arith.constant 1.000000e+00 : f32
    %100 = vector.broadcast %cst_49 : f32 to vector<1x128xf32>
    %101 = arith.addf %99, %100 : vector<1x128xf32>
    %cst_50 = arith.constant 5.000000e-01 : f32
    %102 = vector.broadcast %cst_50 : f32 to vector<1x128xf32>
    %103 = arith.mulf %102, %101 : vector<1x128xf32>
    %c0_51 = arith.constant 0 : index
    %c0_52 = arith.constant 0 : index
    %c0_53 = arith.constant 0 : index
    %c0_54 = arith.constant 0 : index
    %104 = vector.load %arg18[%c0_51, %c0_52, %c0_53, %c0_54] : memref<1x1x1x128xf32, #tpu.memory_space<vmem>>, vector<1x1x1x128xf32>
    %105 = vector.shape_cast %104 : vector<1x1x1x128xf32> to vector<1x128xf32>
    %106 = vector.shape_cast %103 : vector<1x128xf32> to vector<1x1x1x128xf32>
    tpu.vector_store %arg18[%c0_51, %c0_52, %c0_53, %c0_54], %106 {strides = array<i32>} : memref<1x1x1x128xf32, #tpu.memory_space<vmem>>, vector<1x1x1x128xf32>,
    return
  }
  func.func @transform_0(%arg0: i32, %arg1: i32) -> (i32, i32, i32) {
    %c0_i32 = arith.constant 0 : i32
    %c0_i32_0 = arith.constant 0 : i32
    %c0_i32_1 = arith.constant 0 : i32
    return %arg0, %c0_i32, %c0_i32_0 : i32, i32, i32
  }
  func.func @transform_1(%arg0: i32, %arg1: i32) -> (i32, i32) {
    %c0_i32 = arith.constant 0 : i32
    %c0_i32_0 = arith.constant 0 : i32
    return %c0_i32, %arg1 : i32, i32
  }
  func.func @transform_2(%arg0: i32, %arg1: i32) -> (i32, i32) {
    %c0_i32 = arith.constant 0 : i32
    %c0_i32_0 = arith.constant 0 : i32
    %c0_i32_1 = arith.constant 0 : i32
    return %c0_i32, %c0_i32_0 : i32, i32
  }
  func.func @transform_3(%arg0: i32, %arg1: i32) -> (i32, i32) {
    %c0_i32 = arith.constant 0 : i32
    %c0_i32_0 = arith.constant 0 : i32
    %c0_i32_1 = arith.constant 0 : i32
    return %c0_i32, %c0_i32_0 : i32, i32
  }
  func.func @transform_4(%arg0: i32, %arg1: i32) -> (i32, i32) {
    %c0_i32 = arith.constant 0 : i32
    %c0_i32_0 = arith.constant 0 : i32
    %c0_i32_1 = arith.constant 0 : i32
    return %c0_i32, %c0_i32_0 : i32, i32
  }
  func.func @transform_5(%arg0: i32, %arg1: i32) -> (i32, i32) {
    %c0_i32 = arith.constant 0 : i32
    %c0_i32_0 = arith.constant 0 : i32
    %c0_i32_1 = arith.constant 0 : i32
    return %c0_i32, %c0_i32_0 : i32, i32
  }
  func.func @transform_6(%arg0: i32, %arg1: i32) -> (i32, i32) {
    %c0_i32 = arith.constant 0 : i32
    %c0_i32_0 = arith.constant 0 : i32
    return %c0_i32, %arg1 : i32, i32
  }
  func.func @transform_7(%arg0: i32, %arg1: i32) -> (i32, i32) {
    %c0_i32 = arith.constant 0 : i32
    %c0_i32_0 = arith.constant 0 : i32
    return %c0_i32, %arg1 : i32, i32
  }
  func.func @transform_8(%arg0: i32, %arg1: i32) -> (i32, i32) {
    %c0_i32 = arith.constant 0 : i32
    %c0_i32_0 = arith.constant 0 : i32
    %c0_i32_1 = arith.constant 0 : i32
    return %c0_i32, %c0_i32_0 : i32, i32
  }
  func.func @transform_9(%arg0: i32, %arg1: i32) -> (i32, i32) {
    %c0_i32 = arith.constant 0 : i32
    %c0_i32_0 = arith.constant 0 : i32
    %c0_i32_1 = arith.constant 0 : i32
    return %c0_i32, %c0_i32_0 : i32, i32
  }
  func.func @transform_10(%arg0: i32, %arg1: i32) -> (i32, i32) {
    %c0_i32 = arith.constant 0 : i32
    %c0_i32_0 = arith.constant 0 : i32
    %c0_i32_1 = arith.constant 0 : i32
    return %c0_i32, %c0_i32_0 : i32, i32
  }
  func.func @transform_11(%arg0: i32, %arg1: i32) -> (i32, i32) {
    %c0_i32 = arith.constant 0 : i32
    %c0_i32_0 = arith.constant 0 : i32
    %c0_i32_1 = arith.constant 0 : i32
    return %c0_i32, %c0_i32_0 : i32, i32
  }
  func.func @transform_12(%arg0: i32, %arg1: i32) -> (i32, i32) {
    %c0_i32 = arith.constant 0 : i32
    %c0_i32_0 = arith.constant 0 : i32
    %c0_i32_1 = arith.constant 0 : i32
    return %c0_i32, %c0_i32_0 : i32, i32
  }
  func.func @transform_13(%arg0: i32, %arg1: i32) -> (i32, i32) {
    %c0_i32 = arith.constant 0 : i32
    %c0_i32_0 = arith.constant 0 : i32
    %c0_i32_1 = arith.constant 0 : i32
    return %c0_i32, %c0_i32_0 : i32, i32
  }
  func.func @transform_14(%arg0: i32, %arg1: i32) -> (i32, i32) {
    %c0_i32 = arith.constant 0 : i32
    %c0_i32_0 = arith.constant 0 : i32
    %c0_i32_1 = arith.constant 0 : i32
    return %c0_i32, %c0_i32_0 : i32, i32
  }
  func.func @transform_15(%arg0: i32, %arg1: i32) -> (i32, i32) {
    %c0_i32 = arith.constant 0 : i32
    %c0_i32_0 = arith.constant 0 : i32
    %c0_i32_1 = arith.constant 0 : i32
    return %c0_i32, %c0_i32_0 : i32, i32
  }
  func.func @transform_16(%arg0: i32, %arg1: i32) -> (i32, i32, i32, i32) {
    %c0_i32 = arith.constant 0 : i32
    %c0_i32_0 = arith.constant 0 : i32
    %c0_i32_1 = arith.constant 0 : i32
    return %arg0, %arg1, %c0_i32, %c0_i32_0 : i32, i32, i32, i32
  }
}

</mosaic_0001>

<bundles_post_ra>
// kernel: hybrid_xml_forward.1
= control target key start
LH: loop header
LB: loop body
LE: loop exit
PB: predicated region body
PF: predicated region fallthrough
CT: control target
= control target key end

     0   :  { %s2899_s0 = inlined_call_operand.vmem [shape: f32[2,8,64], index: 0, kind: input, shape index: {}]   ;;  %s2900_s1 = inlined_call_operand.vmem [shape: bf16[32,256], index: 1, kind: input, shape index: {}]   ;;  %s2901_s2 = inlined_call_operand.vmem [shape: bf16[64,32], index: 2, kind: input, shape index: {}]   ;;  %s2902_s3 = inlined_call_operand.vmem [shape: f32[1,32], index: 3, kind: input, shape index: {}]   ;;  %s2903_s4 = inlined_call_operand.vmem [shape: bf16[64,32], index: 4, kind: input, shape index: {}]   ;;  %s2904_s5 = inlined_call_operand.vmem [shape: f32[1,32], index: 5, kind: input, shape index: {}]   ;;  %s2905_s6 = inlined_call_operand.vmem [shape: bf16[32,256], index: 6, kind: input, shape index: {}]   ;;  %s2906_s7 = inlined_call_operand.vmem [shape: f32[1,256], index: 7, kind: input, shape index: {}]   ;;  %s2907_s8 = inlined_call_operand.vmem [shape: f32[1,64], index: 8, kind: input, shape index: {}]   ;;  %s2908_s9 = inlined_call_operand.<no memory space> [shape: f32[1,1], index: 9, kind: input, shape index: {}]   ;;  %s2909_s10 = inlined_call_operand.vmem [shape: f32[1,64], index: 10, kind: input, shape index: {}]   ;;  %s2910_s12 = inlined_call_operand.vmem [shape: bf16[64,32], index: 12, kind: input, shape index: {}]   ;;  %s2911_s13 = inlined_call_operand.vmem [shape: f32[1,32], index: 13, kind: input, shape index: {}]   ;;  %s2912_s14 = inlined_call_operand.vmem [shape: f32[1,32], index: 14, kind: input, shape index: {}]   ;;  %s2913_s16 = inlined_call_operand.vmem [shape: f32[2,2,1,128], index: 16, kind: output, shape index: {}]   ;;  %s2914_s11 = inlined_call_operand.<no memory space> [shape: f32[1,1], index: 11, kind: input, shape index: {}]   ;;  %s2915_s15 = inlined_call_operand.<no memory space> [shape: f32[1,1], index: 15, kind: input, shape index: {}]  }
   0x1   :  { %2919 = sst [smem:[#allocation16_spill]] %s2899_s0  ;;  %v21_v0 = vstv %s2908_s9  ;;  %v23_v1 = vstv %s2914_s11  ;;  %v25_v2 = vstv %s2915_s15 }
   0x2   :  { %2920 = sst [smem:[#allocation17_spill]] %s2900_s1  ;;  %22 = vst [vmem:[#allocation6] sm:$0x1] %v21_v0  ;;  %24 = vst [vmem:[#allocation7] sm:$0x1] %v23_v1 }
   0x3   :  { %2921 = sst [smem:[#allocation18_spill]] %s2905_s6  ;;  %26 = vst [vmem:[#allocation8] sm:$0x1] %v25_v2 }
   0x4   :  { %s2580_s27 = smov 0   ;;  %s2582_s28 = smov 0  }
   0x5   :  { %s2584_s29 = smov 0   ;;  %s2586_s30 = smov 0  }
   0x6   :  { %s2588_s9 = smov 0   ;;  %s2590_s0 = smov 0  }
   0x7   :  { %s2592_s11 = smov 0  }
   0x8 LB: > { %2922 = sst [smem:[#allocation11_spill]] %s2471_s9  ;;  %s41_s15 = sadd.s32 1, %s2471_s9  ;;  %s2479_s11 = sphi %s2592_s11, %s32_s11   ;;  %s2475_s0 = sphi %s2590_s0, %s2935_s0   ;;  %s2471_s9 = sphi %s2588_s9, %s2934_s9   ;;  %s2467_s30 = sphi %s2586_s30, %s2933_s30   ;;  %s2463_s29 = sphi %s2584_s29, %s2932_s29   ;;  %s2459_s28 = sphi %s2582_s28, %s2937_s28   ;;  %s2455_s27 = sphi %s2580_s27, %s2936_s27  }
   0x9   : > { %2923 = sst [smem:[#allocation12_spill]] %s2475_s0  ;;  %s44_s17 = sadd.s32 1, %s2475_s0 }
   0xa   : > { %p42_p0 = scmp.ge.s32.totalorder %s41_s15, 2  ;;  %s77_s18 = sadd.s32 1, %s2459_s28 }
   0xb   : > { %p84_p1 = scmp.ne.s32.totalorder %s2459_s28, %s2455_s27  ;;  %p85_p2 = scmp.eq.s32.totalorder %s2479_s11, 0 }
   0xc   : > { %s2939_s15 = smov (%p42_p0, %s41_s15), 0  ;;  %s2941_s17 = smov (!%p42_p0, %s44_s17), %s2475_s0 }
   0xd   : > { %2924 = sst [smem:[#allocation13_spill]] %s2939_s15  ;;  %s74_s19 = ssub.s32 %s2471_s9, %s2939_s15 }
   0xe   : > { %p2626_p3 = por %p85_p2, %p84_p1  ;;  %p46_p4 = scmp.ge.s32.totalorder %s2941_s17, 2 }
   0xf   : > { %p75_p5 = scmp.eq.s32.totalorder %s74_s19, 0  ;;  %p2046_p6 = scmp.ge.s32.totalorder %s2479_s11, 4 }
  0x10   : > { %s2943_s17 = smov (%p46_p4, %s2941_s17), 0 }
  0x11   : > { %2926 = sst [smem:[#allocation14_spill]] %s2943_s17  ;;  %478 = sbr.rel (%p2046_p6) target bundleno = 46 (0x2e), region = 64 }
  0x12   : > { %s2633_s21 = scalar_select %p75_p5, %s2459_s28, %s77_s18  }
  0x14   : > { %2927 = sst [smem:[#allocation15_spill]] %s2633_s21 }
  0x16   : > { %488 = sbr.rel (!%p2626_p3) target bundleno = 34 (0x22), region = 72  ;;  %s490_s22 = sand.u32 (%p2626_p3), 1, %s2459_s28  }
  0x17   : > { %s2048_s23 = sshll.u32 (%p2626_p3), %s2471_s9, 2  ;;  %s2047_s24 = sshll.u32 (%p2626_p3), %s490_s22, 4 }
  0x18   : > { %s2928_s1 = sld [smem:[#allocation17_spill]] (%p2626_p3)  ;;  %s492_s19 = scalar_lea.vmem (%p2626_p3), [#allocation9], %s2047_s24 }
  0x1e   : > { %s494_s15 = scalar_lea.vmem %s2928_s1, %s2048_s23 }
  0x1f   : > { %v511_v3 = vld [vmem:[%s494_s15] sm:$0xf]  ;;  %v513_v4 = vld [vmem:[%s494_s15 + $0x8] sm:$0xf]  ;;  %v515_v5 = vld [vmem:[%s494_s15 + $0x10] sm:$0xf] }
  0x20   : > { %512 = vst [vmem:[%s492_s19] sm:$0xf] %v511_v3  ;;  %514 = vst [vmem:[%s492_s19 + $0x4] sm:$0xf] %v513_v4  ;;  %v517_v6 = vld [vmem:[%s494_s15 + $0x18] sm:$0xf] }
  0x21   : > { %516 = vst [vmem:[%s492_s19 + $0x8] sm:$0xf] %v515_v5  ;;  %518 = vst [vmem:[%s492_s19 + $0xc] sm:$0xf] %v517_v6 }
  0x22 PF: > { %550 = sbr.rel (!%p2626_p3) target bundleno = 46 (0x2e), region = 113  ;;  %s552_s18 = sand.u32 (%p2626_p3), 1, %s2459_s28  }
  0x23   : > { %s2050_s22 = sshll.u32 (%p2626_p3), %s2471_s9, 2  ;;  %s2049_s17 = sshll.u32 (%p2626_p3), %s552_s18, 4 }
  0x24   : > { %s2929_s6 = sld [smem:[#allocation18_spill]] (%p2626_p3)  ;;  %s554_s24 = scalar_lea.vmem (%p2626_p3), [#allocation10], %s2049_s17 }
  0x2a   : > { %s556_s26 = scalar_lea.vmem %s2929_s6, %s2050_s22 }
  0x2b   : > { %v573_v7 = vld [vmem:[%s556_s26] sm:$0xf]  ;;  %v575_v8 = vld [vmem:[%s556_s26 + $0x8] sm:$0xf]  ;;  %v577_v9 = vld [vmem:[%s556_s26 + $0x10] sm:$0xf] }
  0x2c   : > { %574 = vst [vmem:[%s554_s24] sm:$0xf] %v573_v7  ;;  %576 = vst [vmem:[%s554_s24 + $0x4] sm:$0xf] %v575_v8  ;;  %v579_v10 = vld [vmem:[%s556_s26 + $0x18] sm:$0xf] }
  0x2d   : > { %578 = vst [vmem:[%s554_s24 + $0x8] sm:$0xf] %v577_v9  ;;  %580 = vst [vmem:[%s554_s24 + $0xc] sm:$0xf] %v579_v10 }
  0x2e PF: > { %p2051_p7 = scmp.ge.s32.totalorder %s2479_s11, 1  ;;  %p617_p8 = scmp.lt.s32.totalorder %s2479_s11, 5 }
  0x30   : > { %p618_p9 = pnand %p2051_p7, %p617_p8 }
  0x31   : > { %s624_s15 = sand.u32 (!%p618_p9), 1, %s2455_s27   ;;  %p693_p10 = scmp.lt.s32.totalorder (!%p618_p9), %s2467_s30, 1 }
  0x32   : > { %621 = sbr.rel (%p618_p9) target bundleno = 1401 (0x579), region = 158  ;;  %s2654_s17 = sshll.u32 (!%p618_p9), %s624_s15, 4 }
  0x33   : > { %p697_p11 = scmp.lt.s32.totalorder (!%p618_p9), %s2463_s29, 1  ;;  %s2930_s23 = sld [smem:[#allocation16_spill]] (!%p618_p9) }
  0x34   : > { %s626_s21 = scalar_lea.vmem (!%p618_p9), [#allocation9], %s2654_s17  ;;  %p2056_p12 = scmp.ne.s32.totalorder (!%p618_p9), %s2463_s29, 0 }
  0x37   : > { %s2945_s30 = smov (!%p693_p10, %s2467_s30), 1 }
  0x38   : > { %s2659_s20 = scalar_select %p697_p11, %s2463_s29, 1 }
  0x39   : > { %s2054_s19 = sshll.u32 %s2945_s30, 3  ;;  %s2055_s18 = sshll.u32 %s2945_s30, 1 }
  0x3a   : > { %s696_s26 = scalar_lea.vmem %s2930_s23, %s2054_s19  ;;  %s699_s27 = scalar_lea.vmem %s2906_s7, %s2659_s20 }
  0x3b   : > { %s2669_s15 = sadd.s32 %s2055_s18, %s2659_s20  ;;  %v708_v11 = vld [vmem:[%s696_s26] sm:$0xff]  ;;  %s633_s30 = scalar_lea.vmem [#allocation10], %s2654_s17 }
  0x3c   : > { %s706_s9 = scalar_lea.vmem %s2913_s16, %s2669_s15  ;;  %v2675_v12 = vpack.c.bf16 %v708_v11, %v708_v11  ;;  %713 = sbr.rel (%p2056_p12) target bundleno = 294 (0x126), region = 170 }
  0x41   : > { %v2389_v13 = vld [vmem:[%s2903_s4 + $0x18] sm:$0xff]   ;;  %v2481_v14 = vmov 0.0   ;;  %v2390_v15 = vld [vmem:[%s2903_s4 + $0x10] sm:$0xff]   ;;  %vm2482_vm0 = vmmov 0   ;;  %v2392_v18 = vld [vmem:[%s2903_s4 + $0x8] sm:$0xff]   ;;  %vm753_vm1 = vcmask 523264   ;;  %v894_v28 = vlaneseq }
  0x42   : > { %2203 = vmatprep.subr.bf16.mxu1 %v2481_v14  ;;  %2191 = vmatprep.subr.bf16.mxu0 %v2481_v14  ;;  %v2391_v16 = vld [vmem:[%s2901_s2 + $0x18] sm:$0xff]   ;;  %v2393_v17 = vld [vmem:[%s2901_s2 + $0x10] sm:$0xff]   ;;  %v2395_v19 = vld [vmem:[%s2901_s2 + $0x8] sm:$0xff]   ;;  %vm901_vm2 = vcmask 57344   ;;  %vm798_vm3 = vcmask 257024  }
  0x43   : > { %2204 = vmatpush3.bf16.msra.mxu1 %v2389_v13  ;;  %2211 = vmatprep.mubr.msk.bf16.mxu1 %vm2482_vm0, %v2481_v14  ;;  %v2069_v20 = vld [vmem:[%s2907_s8] ss:$0 sm:$0xff]  ;;  %v895_v29 = vand.u32 127, %v894_v28  ;;  %v897_v30 = vshrl.u32 %v894_v28, 7 }
  0x44   : > { %2205 = vmatprep.subr.bf16.mxu1 %v2481_v14  ;;  %2199 = vmatprep.mubr.msk.bf16.mxu0 %vm2482_vm0, %v2481_v14  ;;  %v2070_v21 = vld [vmem:[%s2909_s10] ss:$0 sm:$0xff]  ;;  %v889_v22 = vmul.f32 %v2069_v20, %v708_v11 }
  0x45   : > { %2192 = vmatpush3.bf16.msra.mxu0 %v2391_v16  ;;  %v910_v23 = vmul.f32 %v2070_v21, %v708_v11  ;;  %v2394_v24 = vld [vmem:[%s2903_s4] sm:$0xff]   ;;  %v898_v31 = vsub.s32 %v895_v29, %v897_v30 }
  0x46   : > { %2193 = vmatprep.subr.bf16.mxu0 %v2481_v14  ;;  %v890_v25 = vsel %vm753_vm1, %v889_v22, 0.0  ;;  %v2396_v26 = vld [vmem:[%s2901_s2] sm:$0xff]  }
  0x47   : > { %2206 = vmatpush3.bf16.msra.mxu1 %v2390_v15  ;;  %891 = vadd.xlane.f32.xlu0 %v890_v25  ;;  %v911_v27 = vsel %vm753_vm1, %v910_v23, 0.0  ;;  %v2063_v36 = vld [vmem:[%s2904_s5] ss:$0 sm:$0xff] }
  0x48   : > { %2207 = vmatprep.subr.bf16.mxu1 %v2481_v14  ;;  %v2057_v38 = vld [vmem:[%s2902_s3] ss:$0 sm:$0xff] }
  0x49   : > { %2194 = vmatpush3.bf16.msra.mxu0 %v2393_v17 }
  0x4a   : > { %2195 = vmatprep.subr.bf16.mxu0 %v2481_v14 }
  0x4b   : > { %2208 = vmatpush3.bf16.msra.mxu1 %v2392_v18  ;;  %912 = vadd.xlane.f32.xlu0 %v911_v27 }
  0x4c   : > { %2209 = vmatprep.subr.bf16.mxu1 %v2481_v14 }
  0x4d   : > { %2196 = vmatpush3.bf16.msra.mxu0 %v2395_v19 }
  0x4e   : > { %2197 = vmatprep.subr.bf16.mxu0 %v2481_v14 }
  0x4f   : > { %2210 = vmatpush3.bf16.msra.mxu1 %v2394_v24 }
  0x51   : > { %2198 = vmatpush3.bf16.msra.mxu0 %v2396_v26 }
  0x52   : > { %2212 = vmatmul.mubr.msk.bf16.vlgmr.msra.gmra.mxu1 %vm753_vm1, %v2675_v12 }
  0x54   : > { %2200 = vmatmul.mubr.msk.bf16.vlgmr.msra.gmra.mxu0 %vm753_vm1, %v2675_v12 }
  0xd0   : > { %v892_v32 = vpop.xlane.xlu0 %891 }
  0xd1   : > { %v899_v33 = vrot.slane %v892_v32, %v898_v31 }
  0xd3   : > { %902 = vst.msk [vmem:[#allocation4] sm:$0x1] %vm901_vm2, %v899_v33 }
  0xd4   : > { %v913_v34 = vpop.xlane.xlu0 %912 }
  0xd5   : > { %v918_v35 = vrot.slane %v913_v34, %v898_v31 }
  0xd7   : > { %920 = vst.msk [vmem:[#allocation5] sm:$0x1] %vm901_vm2, %v918_v35 }
 0x112   : > { %v873_v37 = vpop.f32.mrf.mxu1 }
 0x113   : > { %v874_v39 = vadd.f32 %v2063_v36, %v873_v37 }
 0x114   : > { %v2213_v40 = vpop.f32.mrf.mxu1  ;;  %v791_v41 = vpop.f32.mrf.mxu0 }
 0x115   : > { %2397 = vtanh.f32 %v874_v39  ;;  %v792_v42 = vadd.f32 %v2057_v38, %v791_v41 }
 0x116   : > { %v876_v43 = vpop.f32.mrf.mxu1  ;;  %v2201_v44 = vpop.f32.mrf.mxu0 }
 0x117   : > { %v797_v45 = vpack.c.bf16 %v792_v42, %v792_v42 }
 0x118   : > { %v2214_v46 = vpop.f32.mrf.mxu1  ;;  %v794_v47 = vpop.f32.mrf.mxu0 }
 0x119   : > { %799 = vst.msk [vmem:[#allocation2] sm:$0xf] %vm798_vm3, %v797_v45 }
 0x11a   : > { %v2202_v48 = vpop.f32.mrf.mxu0 }
 0x122   : > { %v2398_v49 = vpop.eup %2397 }
 0x123   : > { %v880_v50 = vpack.c.bf16 %v2398_v49, %v2398_v49 }
 0x125   : > { %881 = vst.msk [vmem:[#allocation3] sm:$0xf] %vm798_vm3, %v880_v50 }
 0x126 PF: > { %v2401_v51 = vld [vmem:[%s626_s21 + $0x8] sm:$0xff]   ;;  %v2483_v52 = vmov 0.0   ;;  %v2403_v54 = vld [vmem:[%s626_s21] sm:$0xff]   ;;  %vm2484_vm4 = vmmov 0   ;;  %vm938_vm5 = vcmask 261120   ;;  %v2485_v60 = vmov 0  }
 0x127   : > { %2215 = vmatprep.subr.bf16.mxu1 %v2483_v52  ;;  %2241 = vmatprep.subr.bf16.mxu0 %v2483_v52  ;;  %v2402_v53 = vld [vmem:[%s633_s30 + $0x8] sm:$0xff]   ;;  %v2404_v55 = vld [vmem:[%s633_s30] sm:$0xff]   ;;  %vm1067_vm6 = vcmask 1043456   ;;  %vm1042_vm7 = vcmask 64512   ;;  %vm1649_vm8 = vcmask 523264  }
 0x128   : > { %2216 = vmatpush3.bf16.msra.mxu1 %v2401_v51  ;;  %2219 = vmatprep.mubr.msk.bf16.mxu1 %vm2484_vm4, %v2483_v52  ;;  %v2074_v56 = vld [vmem:[#allocation4] ss:$0 sm:$0xff]  ;;  %v921_v57 = vld [vmem:[#allocation2] sm:$0xf]  ;;  %v2087_v59 = vld [vmem:[#allocation5] ss:$0 sm:$0xff] }
 0x129   : > { %2242 = vmatpush3.bf16.msra.mxu0 %v2402_v53  ;;  %2217 = vmatprep.subr.bf16.mxu1 %v2483_v52  ;;  %v1014_v61 = vld [vmem:[#allocation6] sm:$0x1]  ;;  %v1267_v62 = vld [vmem:[#allocation7] sm:$0x1]  ;;  %v2083_v63 = vld [vmem:[%s699_s27] ss:$0 sm:$0xff] }
 0x12a   : > { %2243 = vmatprep.subr.bf16.mxu0 %v2483_v52  ;;  %2245 = vmatprep.mubr.msk.bf16.mxu0 %vm2484_vm4, %v2483_v52  ;;  %v1069_v30 = vsel %vm1067_vm6, %v2675_v12, 0 }
 0x12b   : > { %1005 = vbcast.lane.b32.xlu1 %v2074_v56, 256 }
 0x12c   : > { %v1168_v58 = vld [vmem:[#allocation3] sm:$0xf]  ;;  %2218 = vmatpush3.bf16.msra.mxu1 %v2403_v54  ;;  %2399 = vset.pattern.permute.xlu1 %v2485_v60 }
 0x12d   : > { %2244 = vmatpush3.bf16.msra.mxu0 %v2404_v55  ;;  %2326 = vmatprep.subr.msk.bf16.mxu1 %vm1067_vm6, %v2675_v12 }
 0x12e   : > { %2327 = vmatprep.subr.msk.bf16.mxu0 %vm1067_vm6, %v2675_v12  ;;  %v1020_v12 = vlaneseq }
 0x12f   : > { %2220 = vmatmul.mubr.msk.bf16.vlgmr.msra.gmra.mxu1 %vm938_vm5, %v921_v57  ;;  %1258 = vbcast.lane.b32.xlu1 %v2087_v59, 256 }
 0x130   : > { %2246 = vmatmul.mubr.msk.bf16.vlgmr.msra.gmra.mxu0 %vm938_vm5, %v1168_v58  ;;  %2224 = vmatpush3.bf16.msra.mxu1 %v1069_v30  ;;  %v1021_v50 = vshrl.u32 %v1020_v12, 7 }
 0x131   : > { %2250 = vmatpush3.bf16.msra.mxu0 %v1069_v30 }
 0x132   : > { %2291 = vmatprep.subr.mxu0 %v2483_v52  ;;  %v2746_v57 = vsub.s32 0, %v1021_v50 }
 0x133   : > { %1017 = vperm.xlu1 %2399, %v1014_v61  }
 0x137   : > { %1270 = vperm.xlu1 %2399, %v1267_v62  }
 0x19d   : > { %v1006_v41 = vpop.permute.xlu1 %1005 }
 0x1a1   : > { %v1259_v46 = vpop.permute.xlu1 %1258 }
 0x1ae   : > { %v1018_v54 = vpop.permute.xlu1 %1017 }
 0x1ef   : > { %v976_v0 = vpop.f32.mrf.mxu1 }
 0x1f0   : > { %v982_v1 = vrot.slane %v976_v0, 4  ;;  %v1229_v2 = vpop.f32.mrf.mxu0 }
 0x1f1   : > { %v1230_v3 = vadd.f32 %v2083_v63, %v1229_v2  ;;  %v2221_v4 = vpop.f32.mrf.mxu1  ;;  %v1023_v63 = vrot.slane %v1018_v54, %v2746_v57 }
 0x1f2   : > { %v983_v5 = vmax.f32 %v976_v0, %v982_v1  ;;  %v2247_v6 = vpop.f32.mrf.mxu0 }
 0x1f3   : > { %v1235_v7 = vrot.slane %v1230_v3, 4  ;;  %v979_v8 = vpop.f32.mrf.mxu1 }
 0x1f4   : > { %v984_v9 = vrot.slane %v983_v5, 2  ;;  %v1232_v10 = vpop.f32.mrf.mxu0 }
 0x1f5   : > { %v1236_v11 = vmax.f32 %v1230_v3, %v1235_v7  ;;  %v2222_v13 = vpop.f32.mrf.mxu1 }
 0x1f6   : > { %v985_v14 = vmax.f32 %v983_v5, %v984_v9  ;;  %v2248_v15 = vpop.f32.mrf.mxu0 }
 0x1f7   : > { %v1237_v16 = vrot.slane %v1236_v11, 2 }
 0x1f8   : > { %v986_v17 = vrot.slane %v985_v14, 1 }
 0x1f9   : > { %v1238_v18 = vmax.f32 %v1236_v11, %v1237_v16 }
 0x1fa   : > { %v987_v19 = vmax.f32 %v985_v14, %v986_v17 }
 0x1fb   : > { %v1239_v20 = vrot.slane %v1238_v18, 1 }
 0x1fc   : > { %v988_v21 = vsub.f32 %v976_v0, %v987_v19  ;;  %v1271_v0 = vpop.permute.xlu1 %1270 }
 0x1fd   : > { %v1240_v22 = vmax.f32 %v1238_v18, %v1239_v20  ;;  %v1276_v4 = vrot.slane %v1271_v0, %v2746_v57 }
 0x1fe   : > { %v989_v23 = vmul.f32 1.442695, %v988_v21 }
 0x1ff   : > { %v1241_v24 = vsub.f32 %v1230_v3, %v1240_v22 }
 0x200   : > { %2409 = vpow2.f32 %v989_v23 }
 0x201   : > { %v1242_v25 = vmul.f32 1.442695, %v1241_v24 }
 0x203   : > { %2411 = vpow2.f32 %v1242_v25 }
 0x20d   : > { %v2410_v26 = vpop.eup %2409 }
 0x20e   : > { %v991_v27 = vrot.slane %v2410_v26, 4 }
 0x210   : > { %v2412_v28 = vpop.eup %2411  ;;  %v992_v29 = vadd.f32 %v2410_v26, %v991_v27 }
 0x211   : > { %v1244_v31 = vrot.slane %v2412_v28, 4 }
 0x212   : > { %v993_v32 = vrot.slane %v992_v29, 2 }
 0x213   : > { %v1245_v33 = vadd.f32 %v2412_v28, %v1244_v31 }
 0x214   : > { %v994_v34 = vadd.f32 %v993_v32, %v992_v29  ;;  %v1788_v32 = vld [vmem:[#allocation8] sm:$0x1] }
 0x215   : > { %v1246_v35 = vrot.slane %v1245_v33, 2 }
 0x216   : > { %v995_v36 = vrot.slane %v994_v34, 1 }
 0x217   : > { %v1247_v37 = vadd.f32 %v1246_v35, %v1245_v33 }
 0x218   : > { %v996_v38 = vadd.f32 %v995_v36, %v994_v34 }
 0x219   : > { %v1248_v39 = vrot.slane %v1247_v37, 1 }
 0x21a   : > { %2413 = vrcp.f32 %v996_v38  ;;  %v2405_v38 = vld [vmem:[%s2910_s12 + $0x18] sm:$0xff]  }
 0x21b   : > { %v1249_v40 = vadd.f32 %v1248_v39, %v1247_v37  ;;  %2267 = vmatprep.subr.bf16.mxu1 %v2405_v38  ;;  %v2406_v39 = vld [vmem:[%s2910_s12 + $0x10] sm:$0xff]  }
 0x21d   : > { %2415 = vrcp.f32 %v1249_v40  ;;  %v2407_v40 = vld [vmem:[%s2910_s12 + $0x8] sm:$0xff]  }
 0x227   : > { %v2414_v42 = vpop.eup %2413 }
 0x228   : > { %v998_v43 = vmul.f32 %v2414_v42, %v2410_v26 }
 0x22a   : > { %v2416_v44 = vpop.eup %2415  ;;  %v1007_v45 = vmul.f32 %v1006_v41, %v998_v43  ;;  %v1025_v47 = vpack.c.bf16 %v998_v43, %v998_v43  ;;  %v2408_v41 = vld [vmem:[%s2910_s12] sm:$0xff]  }
 0x22b   : > { %v1251_v48 = vmul.f32 %v2416_v44, %v2412_v28 }
 0x22c   : > { %v1008_v49 = vrot.slane %v1007_v45, 4  ;;  %1026 = vxpose.xlu0.c.b16.start.end [1/1] (short) %v1025_v47, 128 }
 0x22d   : > { %v1260_v51 = vmul.f32 %v1259_v46, %v1251_v48  ;;  %v1278_v10 = vpack.c.bf16 %v1251_v48, %v1251_v48 }
 0x22e   : > { %v1009_v53 = vadd.f32 %v1008_v49, %v1007_v45 }
 0x22f   : > { %v1261_v55 = vrot.slane %v1260_v51, 4 }
 0x230   : > { %v1010_v56 = vrot.slane %v1009_v53, 2 }
 0x231   : > { %v1262_v58 = vadd.f32 %v1261_v55, %v1260_v51 }
 0x232   : > { %v1011_v59 = vadd.f32 %v1010_v56, %v1009_v53 }
 0x233   : > { %v1263_v61 = vrot.slane %v1262_v58, 2 }
 0x234   : > { %v1012_v62 = vrot.slane %v1011_v59, 1 }
 0x235   : > { %v1264_v1 = vadd.f32 %v1263_v61, %v1262_v58 }
 0x236   : > { %v1013_v2 = vadd.f32 %v1012_v62, %v1011_v59 }
 0x237   : > { %v1265_v3 = vrot.slane %v1264_v1, 1 }
 0x238   : > { %v1024_v5 = vadd.f32 %v1023_v63, %v1013_v2 }
 0x239   : > { %v1266_v6 = vadd.f32 %v1265_v3, %v1264_v1 }
 0x23a   : > { %v1416_v7 = vmul.f32 0.5, %v1024_v5 }
 0x23b   : > { %v1277_v8 = vadd.f32 %v1276_v4, %v1266_v6 }
 0x23c   : > { %2417 = vtanh.f32 %v1416_v7 }
 0x23d   : > { %v1420_v9 = vmul.f32 0.5, %v1277_v8 }
 0x23f   : > { %2419 = vtanh.f32 %v1420_v9 }
 0x249   : > { %v2418_v11 = vpop.eup %2417  ;;  %1279 = vxpose.xlu0.c.b16.start.end [1/1] (short) %v1278_v10, 128 }
 0x24a   : > { %v1418_v13 = vadd.f32 1.0, %v2418_v11 }
 0x24c   : > { %v2420_v14 = vpop.eup %2419  ;;  %v1419_v16 = vmul.f32 0.5, %v1418_v13 }
 0x24d   : > { %v1422_v15 = vadd.f32 1.0, %v2420_v14 }
 0x24f   : > { %v1423_v17 = vmul.f32 0.5, %v1422_v15 }
 0x251   : > { %v1424_v18 = vadd.f32 %v1423_v17, %v1419_v16 }
 0x252   : > { %2400 = vset.pattern.permute.xlu0 %v2485_v60 }
 0x253   : > { %2421 = vrcp.f32 %v1424_v18 }
 0x260   : > { %v2422_v19 = vpop.eup %2421 }
 0x261   : > { %v1426_v20 = vmul.f32 %v2422_v19, %v1419_v16 }
 0x263   : > { %1428 = vbcast.lane.b32.xlu1 %v1426_v20, 256  ;;  %v1506_v21 = vsub.f32 1.0, %v1426_v20 }
 0x267   : > { %1432 = vbcast.lane.b32.xlu1 %v1426_v20, 264 }
 0x26b   : > { %1436 = vbcast.lane.b32.xlu1 %v1426_v20, 272 }
 0x26e   : > { %1440 = vbcast.lane.b32.xlu0 %v1426_v20, 280 }
 0x26f   : > { %1444 = vbcast.lane.b32.xlu1 %v1426_v20, 288 }
 0x272   : > { %1464 = vbcast.lane.b32.xlu0 %v1426_v20, 328 }
 0x273   : > { %1448 = vbcast.lane.b32.xlu1 %v1426_v20, 296 }
 0x276   : > { %1472 = vbcast.lane.b32.xlu0 %v1426_v20, 344 }
 0x277   : > { %1452 = vbcast.lane.b32.xlu1 %v1426_v20, 304 }
 0x27a   : > { %1480 = vbcast.lane.b32.xlu0 %v1426_v20, 360 }
 0x27b   : > { %1456 = vbcast.lane.b32.xlu1 %v1426_v20, 312 }
 0x27e   : > { %1488 = vbcast.lane.b32.xlu0 %v1426_v20, 376 }
 0x27f   : > { %1460 = vbcast.lane.b32.xlu1 %v1426_v20, 320 }
 0x282   : > { %1536 = vbcast.lane.b32.xlu0 %v1506_v21, 312 }
 0x283   : > { %1468 = vbcast.lane.b32.xlu1 %v1426_v20, 336 }
 0x286   : > { %1544 = vbcast.lane.b32.xlu0 %v1506_v21, 328 }
 0x287   : > { %1476 = vbcast.lane.b32.xlu1 %v1426_v20, 352 }
 0x28a   : > { %1552 = vbcast.lane.b32.xlu0 %v1506_v21, 344 }
 0x28b   : > { %1484 = vbcast.lane.b32.xlu1 %v1426_v20, 368 }
 0x28e   : > { %v1034_v60 = vpop.trf.xlu0  ;;  %1560 = vbcast.lane.b32.xlu0 %v1506_v21, 360 }
 0x28f   : > { %1508 = vbcast.lane.b32.xlu1 %v1506_v21, 256  ;;  %2225 = vmatprep.mubr.msk.bf16.mxu1 %vm1042_vm7, %v1034_v60 }
 0x292   : > { %v1035_v22 = vpop.trf.xlu0  ;;  %1568 = vbcast.lane.b32.xlu0 %v1506_v21, 376 }
 0x293   : > { %1512 = vbcast.lane.b32.xlu1 %v1506_v21, 264  ;;  %2226 = vmatmul.mubr.msk.bf16.vlgmr.msra.gmra.mxu1 %vm1042_vm7, %v1035_v22 }
 0x294   : > { %2268 = vmatpush3.bf16.msra.mxu1 %v2405_v38 }
 0x295   : > { %2269 = vmatprep.subr.bf16.mxu1 %v2406_v39 }
 0x296   : > { %v1036_v23 = vpop.trf.xlu0 }
 0x297   : > { %1516 = vbcast.lane.b32.xlu1 %v1506_v21, 272  ;;  %2229 = vmatprep.mubr.msk.bf16.mxu1 %vm1042_vm7, %v1036_v23 }
 0x298   : > { %2270 = vmatpush3.bf16.msra.mxu1 %v2406_v39 }
 0x299   : > { %2271 = vmatprep.subr.bf16.mxu1 %v2407_v40 }
 0x29a   : > { %v1037_v24 = vpop.trf.xlu0 }
 0x29b   : > { %1520 = vbcast.lane.b32.xlu1 %v1506_v21, 280  ;;  %2230 = vmatmul.mubr.msk.bf16.gmra.mxu1 %vm1042_vm7, %v1037_v24 }
 0x29c   : > { %2272 = vmatpush3.bf16.msra.mxu1 %v2407_v40 }
 0x29d   : > { %2273 = vmatprep.subr.bf16.mxu1 %v2408_v41 }
 0x29e   : > { %v1038_v25 = vpop.trf.xlu0 }
 0x29f   : > { %1524 = vbcast.lane.b32.xlu1 %v1506_v21, 288  ;;  %2233 = vmatprep.mubr.msk.bf16.mxu1 %vm1042_vm7, %v1038_v25 }
 0x2a0   : > { %2274 = vmatpush3.bf16.msra.mxu1 %v2408_v41 }
 0x2a2   : > { %v1039_v26 = vpop.trf.xlu0 }
 0x2a3   : > { %1528 = vbcast.lane.b32.xlu1 %v1506_v21, 296  ;;  %2234 = vmatmul.mubr.msk.bf16.gmra.mxu1 %vm1042_vm7, %v1039_v26 }
 0x2a6   : > { %v1040_v27 = vpop.trf.xlu0 }
 0x2a7   : > { %1532 = vbcast.lane.b32.xlu1 %v1506_v21, 304  ;;  %2237 = vmatprep.mubr.msk.bf16.mxu1 %vm1042_vm7, %v1040_v27 }
 0x2aa   : > { %v1041_v28 = vpop.trf.xlu0 }
 0x2ab   : > { %1540 = vbcast.lane.b32.xlu1 %v1506_v21, 320  ;;  %2238 = vmatmul.mubr.msk.bf16.gmra.mxu1 %vm1042_vm7, %v1041_v28 }
 0x2ae   : > { %v1287_v29 = vpop.trf.xlu0 }
 0x2af   : > { %1548 = vbcast.lane.b32.xlu1 %v1506_v21, 336  ;;  %2251 = vmatprep.mubr.msk.bf16.mxu0 %vm1042_vm7, %v1287_v29 }
 0x2b2   : > { %v1288_v30 = vpop.trf.xlu0 }
 0x2b3   : > { %1556 = vbcast.lane.b32.xlu1 %v1506_v21, 352  ;;  %2252 = vmatmul.mubr.msk.bf16.vlgmr.msra.gmra.mxu0 %vm1042_vm7, %v1288_v30 }
 0x2b6   : > { %v1289_v31 = vpop.trf.xlu0 }
 0x2b7   : > { %1564 = vbcast.lane.b32.xlu1 %v1506_v21, 368  ;;  %2255 = vmatprep.mubr.msk.bf16.mxu0 %vm1042_vm7, %v1289_v31 }
 0x2ba   : > { %v1290_v33 = vpop.trf.xlu0 }
 0x2bb   : > { %1791 = vperm.xlu1 %2399, %v1788_v32   ;;  %2256 = vmatmul.mubr.msk.bf16.gmra.mxu0 %vm1042_vm7, %v1290_v33 }
 0x2be   : > { %v1291_v34 = vpop.trf.xlu0 }
 0x2bf   : > { %2259 = vmatprep.mubr.msk.bf16.mxu0 %vm1042_vm7, %v1291_v34 }
 0x2c2   : > { %v1292_v35 = vpop.trf.xlu0 }
 0x2c3   : > { %2260 = vmatmul.mubr.msk.bf16.gmra.mxu0 %vm1042_vm7, %v1292_v35 }
 0x2c6   : > { %v1293_v36 = vpop.trf.xlu0 }
 0x2c7   : > { %2263 = vmatprep.mubr.msk.bf16.mxu0 %vm1042_vm7, %v1293_v36 }
 0x2ca   : > { %v1294_v37 = vpop.trf.xlu0 }
 0x2cb   : > { %2264 = vmatmul.mubr.msk.bf16.gmra.mxu0 %vm1042_vm7, %v1294_v37 }
 0x2cc   : > { %2323 = vmatprep.mubr.msk.f32.mxu0 %vm2484_vm4, %v2483_v52 }
 0x2d5   : > { %v1429_v42 = vpop.permute.xlu1 %1428 }
 0x2d9   : > { %v1433_v43 = vpop.permute.xlu1 %1432 }
 0x2dd   : > { %v1437_v12 = vpop.permute.xlu1 %1436 }
 0x2e0   : > { %v1441_v56 = vpop.permute.xlu0 %1440 }
 0x2e1   : > { %v2781_v44 = vpop.permute.xlu1 %1444 }
 0x2e4   : > { %v2795_v61 = vpop.permute.xlu0 %1464 }
 0x2e5   : > { %v2783_v45 = vpop.permute.xlu1 %1448 }
 0x2e8   : > { %v2797_v1 = vpop.permute.xlu0 %1472 }
 0x2e9   : > { %v2785_v46 = vpop.permute.xlu1 %1452 }
 0x2ec   : > { %v2799_v4 = vpop.permute.xlu0 %1480 }
 0x2ed   : > { %v1457_v47 = vpop.permute.xlu1 %1456 }
 0x2f0   : > { %v2801_v8 = vpop.permute.xlu0 %1488 }
 0x2f1   : > { %v2787_v48 = vpop.permute.xlu1 %1460 }
 0x2f4   : > { %v1537_v14 = vpop.permute.xlu0 %1536 }
 0x2f5   : > { %v2789_v49 = vpop.permute.xlu1 %1468 }
 0x2f8   : > { %v1545_v29 = vpop.permute.xlu0 %1544 }
 0x2f9   : > { %v2791_v50 = vpop.permute.xlu1 %1476 }
 0x2fd   : > { %v2793_v51 = vpop.permute.xlu1 %1484 }
 0x301   : > { %v1509_v54 = vpop.permute.xlu1 %1508 }
 0x305   : > { %v1513_v58 = vpop.permute.xlu1 %1512 }
 0x309   : > { %v1517_v63 = vpop.permute.xlu1 %1516 }
 0x30d   : > { %v1521_v2 = vpop.permute.xlu1 %1520 }
 0x311   : > { %v1525_v6 = vpop.permute.xlu1 %1524 }
 0x315   : > { %v1529_v9 = vpop.permute.xlu1 %1528 }
 0x319   : > { %v1533_v17 = vpop.permute.xlu1 %1532 }
 0x31d   : > { %v1541_v34 = vpop.permute.xlu1 %1540 }
 0x353   : > { %v2227_v53 = vpop.f32.mrf.mxu1 }
 0x354   : > { %v1492_v25 = vmul.f32 %v2227_v53, %v1437_v12  ;;  %v1553_v12 = vpop.permute.xlu0 %1552 }
 0x355   : > { %v1105_v55 = vpop.f32.mrf.mxu1 }
 0x356   : > { %v1490_v22 = vmul.f32 %v1429_v42, %v1105_v55 }
 0x357   : > { %v2228_v59 = vpop.f32.mrf.mxu1 }
 0x358   : > { %v1493_v20 = vmul.f32 %v2228_v59, %v1441_v56 }
 0x359   : > { %v1108_v62 = vpop.f32.mrf.mxu1 }
 0x35a   : > { %v1491_v23 = vmul.f32 %v1433_v43, %v1108_v62 }
 0x35b   : > { %v2231_v0 = vpop.f32.mrf.mxu1 }
 0x35c   : > { %v1496_v56 = vmul.f32 %v2231_v0, %v2785_v46 }
 0x35d   : > { %v1121_v3 = vpop.f32.mrf.mxu1 }
 0x35e   : > { %v1494_v53 = vmul.f32 %v2781_v44, %v1121_v3 }
 0x35f   : > { %v2232_v5 = vpop.f32.mrf.mxu1 }
 0x360   : > { %v1497_v41 = vmul.f32 %v2232_v5, %v1457_v47 }
 0x361   : > { %v1124_v7 = vpop.f32.mrf.mxu1 }
 0x363   : > { %v2803_v10 = vpop.f32.mrf.mxu1 }
 0x365   : > { %v1137_v15 = vpop.f32.mrf.mxu1 }
 0x367   : > { %v2236_v26 = vpop.f32.mrf.mxu1 }
 0x369   : > { %v1140_v36 = vpop.f32.mrf.mxu1 }
 0x373   : > { %v2253_v11 = vpop.f32.mrf.mxu0 }
 0x374   : > { %v1572_v21 = vmul.f32 %v2253_v11, %v1517_v63  ;;  %v1549_v63 = vpop.permute.xlu1 %1548 }
 0x375   : > { %v1353_v13 = vpop.f32.mrf.mxu0 }
 0x376   : > { %v1570_v18 = vmul.f32 %v1509_v54, %v1353_v13  ;;  %v1588_v32 = vadd.f32 %v1572_v21, %v1492_v25  ;;  %v1495_v54 = vmul.f32 %v2783_v45, %v1124_v7  ;;  %v1501_v45 = vmul.f32 %v2236_v26, %v2797_v1 }
 0x377   : > { %v2254_v16 = vpop.f32.mrf.mxu0  ;;  %v1498_v7 = vmul.f32 %v2787_v48, %v1137_v15 }
 0x378   : > { %v1573_v19 = vmul.f32 %v2254_v16, %v1521_v2  ;;  %v1586_v30 = vadd.f32 %v1570_v18, %v1490_v22  ;;  %v1557_v3 = vpop.permute.xlu1 %1556 }
 0x379   : > { %v1356_v60 = vpop.f32.mrf.mxu0 }
 0x37a   : > { %v1571_v24 = vmul.f32 %v1513_v58, %v1356_v60  ;;  %v1589_v27 = vadd.f32 %v1573_v19, %v1493_v20  ;;  %v2239_v58 = vpop.f32.mrf.mxu1  ;;  %v1500_v20 = vmul.f32 %v2803_v10, %v2789_v49 }
 0x37b   : > { %v2257_v28 = vpop.f32.mrf.mxu0 }
 0x37c   : > { %v1587_v31 = vadd.f32 %v1571_v24, %v1491_v23  ;;  %v1603_v37 = vpack.c.bf16 %v1589_v27, %v1588_v32  ;;  %v1576_v42 = vmul.f32 %v2257_v28, %v1533_v17  ;;  %v1153_v13 = vpop.f32.mrf.mxu1  ;;  %v1561_v17 = vpop.permute.xlu0 %1560 }
 0x37d   : > { %v1369_v33 = vpop.f32.mrf.mxu0  ;;  %v1565_v32 = vpop.permute.xlu1 %1564 }
 0x37e   : > { %v1602_v35 = vpack.c.bf16 %v1587_v31, %v1586_v30  ;;  %v1574_v39 = vmul.f32 %v1525_v6, %v1369_v33  ;;  %v1592_v11 = vadd.f32 %v1576_v42, %v1496_v56  ;;  %v2240_v21 = vpop.f32.mrf.mxu1 }
 0x37f   : > { %v2258_v38 = vpop.f32.mrf.mxu0 }
 0x380   : > { %v1577_v40 = vmul.f32 %v2258_v38, %v1537_v14  ;;  %2275 = vmatprep.mubr.msk.bf16.mxu1 %vm1649_vm8, %v1602_v35  ;;  %v1590_v2 = vadd.f32 %v1574_v39, %v1494_v53  ;;  %v1569_v26 = vpop.permute.xlu0 %1568  ;;  %v1156_v28 = vpop.f32.mrf.mxu1  ;;  %v1504_v35 = vmul.f32 %v2239_v58, %v2793_v51 }
 0x381   : > { %v1372_v43 = vpop.f32.mrf.mxu0  ;;  %2276 = vmatmul.mubr.msk.bf16.vlgmr.msra.gmra.mxu1 %vm1649_vm8, %v1603_v37  ;;  %v1503_v33 = vmul.f32 %v2799_v4, %v1156_v28 }
 0x382   : > { %v1575_v55 = vmul.f32 %v1529_v9, %v1372_v43  ;;  %v1593_v59 = vadd.f32 %v1577_v40, %v1497_v41  ;;  %v1499_v9 = vmul.f32 %v2795_v61, %v1140_v36  ;;  %v1505_v61 = vmul.f32 %v2240_v21, %v2801_v8 }
 0x383   : > { %v2261_v62 = vpop.f32.mrf.mxu0 }
 0x384   : > { %v1591_v6 = vadd.f32 %v1575_v55, %v1495_v54  ;;  %v1605_v14 = vpack.c.bf16 %v1593_v59, %v1592_v11  ;;  %v1580_v46 = vmul.f32 %v2261_v62, %v1549_v63  ;;  %v2096_v63 = vld [vmem:[%s2911_s13] ss:$0 sm:$0xff] }
 0x385   : > { %v1385_v47 = vpop.f32.mrf.mxu0 }
 0x386   : > { %v1604_v5 = vpack.c.bf16 %v1591_v6, %v1590_v2  ;;  %v1578_v18 = vmul.f32 %v1541_v34, %v1385_v47  ;;  %v1596_v25 = vadd.f32 %v1580_v46, %v1500_v20 }
 0x387   : > { %v2262_v16 = vpop.f32.mrf.mxu0 }
 0x388   : > { %v1581_v44 = vmul.f32 %v2262_v16, %v1553_v12  ;;  %2279 = vmatprep.mubr.msk.bf16.mxu1 %vm1649_vm8, %v1604_v5  ;;  %v1594_v23 = vadd.f32 %v1578_v18, %v1498_v7 }
 0x389   : > { %v1388_v0 = vpop.f32.mrf.mxu0  ;;  %2280 = vmatmul.mubr.msk.bf16.gmra.mxu1 %vm1649_vm8, %v1605_v14 }
 0x38a   : > { %v1579_v19 = vmul.f32 %v1545_v29, %v1388_v0  ;;  %v1597_v60 = vadd.f32 %v1581_v44, %v1501_v45  ;;  %v1502_v29 = vmul.f32 %v2791_v50, %v1153_v13 }
 0x38b   : > { %v2265_v22 = vpop.f32.mrf.mxu0 }
 0x38c   : > { %v1595_v24 = vadd.f32 %v1579_v19, %v1499_v9  ;;  %v1607_v30 = vpack.c.bf16 %v1597_v60, %v1596_v25  ;;  %v1584_v49 = vmul.f32 %v2265_v22, %v1565_v32 }
 0x38d   : > { %v1401_v1 = vpop.f32.mrf.mxu0 }
 0x38e   : > { %v1606_v27 = vpack.c.bf16 %v1595_v24, %v1594_v23  ;;  %v1582_v48 = vmul.f32 %v1557_v3, %v1401_v1  ;;  %v1600_v39 = vadd.f32 %v1584_v49, %v1504_v35  ;;  %v1792_v49 = vpop.permute.xlu1 %1791 }
 0x38f   : > { %v2266_v31 = vpop.f32.mrf.mxu0 }
 0x390   : > { %v1585_v15 = vmul.f32 %v2266_v31, %v1569_v26  ;;  %2283 = vmatprep.mubr.msk.bf16.mxu1 %vm1649_vm8, %v1606_v27  ;;  %v1598_v37 = vadd.f32 %v1582_v48, %v1502_v29 }
 0x391   : > { %v1404_v10 = vpop.f32.mrf.mxu0  ;;  %2284 = vmatmul.mubr.msk.bf16.gmra.mxu1 %vm1649_vm8, %v1607_v30 }
 0x392   : > { %v1583_v34 = vmul.f32 %v1561_v17, %v1404_v10  ;;  %v1601_v36 = vadd.f32 %v1585_v15, %v1505_v61  ;;  %v1787_v61 = vld [vmem:[%s2912_s14] sm:$0x1]  ;;  %v1797_v10 = vrot.slane %v1792_v49, %v2746_v57 }
 0x394   : > { %v1599_v38 = vadd.f32 %v1583_v34, %v1503_v33  ;;  %v1609_v41 = vpack.c.bf16 %v1601_v36, %v1600_v39 }
 0x396   : > { %v1608_v40 = vpack.c.bf16 %v1599_v38, %v1598_v37 }
 0x398   : > { %2287 = vmatprep.mubr.msk.bf16.mxu1 %vm1649_vm8, %v1608_v40 }
 0x399   : > { %2288 = vmatmul.mubr.msk.bf16.gmra.mxu1 %vm1649_vm8, %v1609_v41 }
 0x441   : > { %v2825_v8 = vpop.f32.mrf.mxu1 }
 0x442   : > { %v1717_v27 = vadd.f32 %v2825_v8, %v2096_v63 }
 0x443   : > { %v2827_v42 = vpop.f32.mrf.mxu1 }
 0x444   : > { %v1773_v30 = vmax.f32 %v1717_v27, 0.0  ;;  %v1709_v32 = vadd.f32 %v2096_v63, %v2827_v42 }
 0x445   : > { %v2278_v50 = vpop.f32.mrf.mxu1 }
 0x446   : > { %v1720_v1 = vadd.f32 %v2278_v50, %v2096_v63  ;;  %v1771_v15 = vmax.f32 %v1709_v32, 0.0 }
 0x447   : > { %v2829_v43 = vpop.f32.mrf.mxu1 }
 0x448   : > { %v1774_v28 = vmax.f32 %v1720_v1, 0.0  ;;  %v1712_v31 = vadd.f32 %v2096_v63, %v2829_v43 }
 0x449   : > { %v2281_v4 = vpop.f32.mrf.mxu1 }
 0x44a   : > { %v1733_v21 = vadd.f32 %v2281_v4, %v2096_v63  ;;  %v1772_v48 = vmax.f32 %v1712_v31, 0.0 }
 0x44b   : > { %v1724_v12 = vpop.f32.mrf.mxu1 }
 0x44c   : > { %v1777_v22 = vmax.f32 %v1733_v21, 0.0  ;;  %v1725_v24 = vadd.f32 %v2096_v63, %v1724_v12 }
 0x44d   : > { %v2282_v51 = vpop.f32.mrf.mxu1 }
 0x44e   : > { %v1736_v19 = vadd.f32 %v2282_v51, %v2096_v63  ;;  %v1775_v26 = vmax.f32 %v1725_v24, 0.0 }
 0x44f   : > { %v1727_v53 = vpop.f32.mrf.mxu1 }
 0x450   : > { %v1778_v60 = vmax.f32 %v1736_v19, 0.0  ;;  %v1728_v23 = vadd.f32 %v2096_v63, %v1727_v53 }
 0x451   : > { %v2285_v54 = vpop.f32.mrf.mxu1 }
 0x452   : > { %v1749_v45 = vadd.f32 %v2285_v54, %v2096_v63  ;;  %v1776_v25 = vmax.f32 %v1728_v23, 0.0 }
 0x453   : > { %v1740_v55 = vpop.f32.mrf.mxu1 }
 0x454   : > { %v1781_v0 = vmax.f32 %v1749_v45, 0.0  ;;  %v1741_v7 = vadd.f32 %v2096_v63, %v1740_v55 }
 0x455   : > { %v2286_v56 = vpop.f32.mrf.mxu1 }
 0x456   : > { %v1752_v18 = vadd.f32 %v2286_v56, %v2096_v63  ;;  %v1779_v20 = vmax.f32 %v1741_v7, 0.0 }
 0x457   : > { %v1743_v58 = vpop.f32.mrf.mxu1 }
 0x458   : > { %v1782_v46 = vmax.f32 %v1752_v18, 0.0  ;;  %v1744_v3 = vadd.f32 %v2096_v63, %v1743_v58 }
 0x459   : > { %v2289_v59 = vpop.f32.mrf.mxu1 }
 0x45a   : > { %v1765_v11 = vadd.f32 %v2289_v59, %v2096_v63  ;;  %v1780_v9 = vmax.f32 %v1744_v3, 0.0 }
 0x45b   : > { %v1756_v62 = vpop.f32.mrf.mxu1 }
 0x45c   : > { %v1785_v13 = vmax.f32 %v1765_v11, 0.0  ;;  %v1757_v16 = vadd.f32 %v2096_v63, %v1756_v62 }
 0x45d   : > { %v2290_v2 = vpop.f32.mrf.mxu1 }
 0x45e   : > { %v1768_v6 = vadd.f32 %v2290_v2, %v2096_v63  ;;  %v1783_v44 = vmax.f32 %v1757_v16, 0.0 }
 0x45f   : > { %v1759_v5 = vpop.f32.mrf.mxu1 }
 0x460   : > { %v1786_v47 = vmax.f32 %v1768_v6, 0.0  ;;  %v1760_v14 = vadd.f32 %v2096_v63, %v1759_v5 }
 0x462   : > { %2292 = vmatpush3.xpose.msk.msra.mxu0 %vm938_vm5, %v1786_v47  ;;  %v1784_v17 = vmax.f32 %v1760_v14, 0.0 }
 0x463   : > { %2293 = vmatprep.subr.mxu0 %v2483_v52 }
 0x466   : > { %2294 = vmatpush3.xpose.msk.msra.mxu0 %vm938_vm5, %v1785_v13 }
 0x467   : > { %2295 = vmatprep.subr.mxu0 %v2483_v52 }
 0x46a   : > { %2296 = vmatpush3.xpose.msk.msra.mxu0 %vm938_vm5, %v1784_v17 }
 0x46b   : > { %2297 = vmatprep.subr.mxu0 %v2483_v52 }
 0x46e   : > { %2298 = vmatpush3.xpose.msk.msra.mxu0 %vm938_vm5, %v1783_v44 }
 0x46f   : > { %2299 = vmatprep.subr.mxu0 %v2483_v52 }
 0x472   : > { %2300 = vmatpush3.xpose.msk.msra.mxu0 %vm938_vm5, %v1782_v46 }
 0x473   : > { %2301 = vmatprep.subr.mxu0 %v2483_v52 }
 0x476   : > { %2302 = vmatpush3.xpose.msk.msra.mxu0 %vm938_vm5, %v1781_v0 }
 0x477   : > { %2303 = vmatprep.subr.mxu0 %v2483_v52 }
 0x47a   : > { %2304 = vmatpush3.xpose.msk.msra.mxu0 %vm938_vm5, %v1780_v9 }
 0x47b   : > { %2305 = vmatprep.subr.mxu0 %v2483_v52 }
 0x47e   : > { %2306 = vmatpush3.xpose.msk.msra.mxu0 %vm938_vm5, %v1779_v20 }
 0x47f   : > { %2307 = vmatprep.subr.mxu0 %v2483_v52 }
 0x482   : > { %2308 = vmatpush3.xpose.msk.msra.mxu0 %vm938_vm5, %v1778_v60 }
 0x483   : > { %2309 = vmatprep.subr.mxu0 %v2483_v52 }
 0x486   : > { %2310 = vmatpush3.xpose.msk.msra.mxu0 %vm938_vm5, %v1777_v22 }
 0x487   : > { %2311 = vmatprep.subr.mxu0 %v2483_v52 }
 0x48a   : > { %2312 = vmatpush3.xpose.msk.msra.mxu0 %vm938_vm5, %v1776_v25 }
 0x48b   : > { %2313 = vmatprep.subr.mxu0 %v2483_v52 }
 0x48e   : > { %2314 = vmatpush3.xpose.msk.msra.mxu0 %vm938_vm5, %v1775_v26 }
 0x48f   : > { %2315 = vmatprep.subr.mxu0 %v2483_v52 }
 0x492   : > { %2316 = vmatpush3.xpose.msk.msra.mxu0 %vm938_vm5, %v1774_v28 }
 0x493   : > { %2317 = vmatprep.subr.mxu0 %v2483_v52 }
 0x496   : > { %2318 = vmatpush3.xpose.msk.msra.mxu0 %vm938_vm5, %v1773_v30 }
 0x497   : > { %2319 = vmatprep.subr.mxu0 %v2483_v52 }
 0x49a   : > { %2320 = vmatpush3.xpose.msk.msra.mxu0 %vm938_vm5, %v1772_v48 }
 0x49b   : > { %2321 = vmatprep.subr.mxu0 %v2483_v52 }
 0x49e   : > { %2322 = vmatpush3.xpose.msk.msra.mxu0 %vm938_vm5, %v1771_v15 }
 0x4a1   : > { %2324 = vmatmul.mubr.msk.f32.vlgmr.msra.gmra.mxu0 %vm938_vm5, %v1787_v61 }
 0x561   : > { %v1915_v29 = vpop.f32.mrf.mxu0 }
 0x562   : > { %v1916_v33 = vadd.f32 %v1915_v29, %v1797_v10 }
 0x563   : > { %v2325_v34 = vpop.f32.mrf.mxu0 }
 0x564   : > { %v1919_v35 = vmul.f32 0.5, %v1916_v33 }
 0x566   : > { %2423 = vtanh.f32 %v1919_v35 }
 0x573   : > { %v2424_v36 = vpop.eup %2423 }
 0x574   : > { %v1921_v37 = vadd.f32 1.0, %v2424_v36 }
 0x576   : > { %v1922_v52 = vmul.f32 0.5, %v1921_v37 }
 0x578   : > { %1923 = vst [vmem:[%s706_s9] sm:$0x1] %v1922_v52 }
 0x579 PF: > { %s32_s11 = sadd.s32 1, %s2479_s11   ;;  %s2931_s21 = sld [smem:[#allocation15_spill]] }
 0x57a   : > { %p29_p13 = scmp.ge.s32.totalorder %s32_s11, 6   ;;  %s2932_s29 = sld [smem:[#allocation11_spill]] }
 0x57b   : > { %s2933_s30 = sld [smem:[#allocation12_spill]]  ;;  %s2936_s27 = smov %s2459_s28 }
 0x57c   : > { %s2934_s9 = sld [smem:[#allocation13_spill]]  ;;  %31 = sbr.rel (!%p29_p13) target bundleno = 8 (0x8), region = 219 }
 0x57d   : > { %s2935_s0 = sld [smem:[#allocation14_spill]] }
 0x57f   : > { %s2937_s28 = smov %s2931_s21 }

</bundles_post_ra>
